<compile_context>
chip_gen: v6e
topology: v6e:2x2x1
jax: 0.10.0
libtpu: 0.0.40
codegen_flags: <defaults>
</compile_context>

<pallas_src>
import functools

import jax
import jax.numpy as jnp
from jax import lax
from jax.experimental import pallas as pl
from jax.experimental.pallas import tpu as pltpu


# ----------------------------------------------------------------------------
# Pallas kernel (one batch block per grid step)
# ----------------------------------------------------------------------------
def _mulcat_kernel(
    x_ref,                 # (Tp*Bt, D)   bf16, time-major within the block
    wih_ref,               # (D, 8H)      bf16  fused ih weights, gate-major cols
    b_ref,                 # (1, 8H)      f32   fused ih+hh biases
    whh_ref,               # (2H, 8H)     bf16  block-diag fused recurrent weights
    wproj_ref,             # (2H, 2D)     bf16  block-diag [rnn_proj | gate_rnn_proj]
    bproj_ref,             # (1, 2D)      f32
    wbg_ref,               # (D, D)       bf16  block_projection (gated half)
    wbx_ref,               # (D, D)       bf16  block_projection (input half)
    bb_ref,                # (1, D)       f32
    out_ref,               # (Tp*Bt, D)   f32
    gates_sc,              # scratch (Tc*Bt, 8H) bf16  per-chunk ih gates
    hs_sc,                 # scratch (Tp*Bt, 2H) bf16  fused hidden states
    *, t_pad, t_chunk,
):
    TB, D = x_ref.shape
    Bt = TB // t_pad
    H2 = whh_ref.shape[0]            # 2H
    H = H2 // 2
    n_chunks = t_pad // t_chunk
    rows_per_chunk = t_chunk * Bt

    # Hoisted weight / bias loads (constant across the recurrence).
    wih = wih_ref[...]               # (D, 8H) bf16
    whh = whh_ref[...]               # (2H, 8H) bf16
    bias = b_ref[...]                # (1, 8H) f32

    def sigm(v):
        # sigmoid(x) = 0.5*tanh(0.5*x) + 0.5  -> single EUP op + cheap VPU.
        return 0.5 * jnp.tanh(0.5 * v) + 0.5

    def chunk_body(ci, carry):
        h, c = carry                 # h: (Bt, 2H) bf16, c: (Bt, 2H) f32
        row0 = pl.multiple_of(ci * rows_per_chunk, rows_per_chunk)

        # Input-to-hidden gates for BOTH LSTMs for this time chunk: one big
        # bf16 MXU matmul, bias added once, stored bf16.
        x_chunk = x_ref[pl.ds(row0, rows_per_chunk), :]
        gates_sc[...] = (
            jnp.dot(x_chunk, wih, preferred_element_type=jnp.float32) + bias
        ).astype(gates_sc.dtype)

        # Fused recurrence over this chunk.  Gate-major fused layout:
        # columns [i1 i2 | f1 f2 | g1 g2 | o1 o2], state halves [h1|h2],[c1|c2].
        def step(tl, inner):
            h, c = inner
            loc = pl.multiple_of(tl * Bt, Bt)
            g = gates_sc[pl.ds(loc, Bt), :].astype(jnp.float32) + jnp.dot(
                h, whh, preferred_element_type=jnp.float32)        # (Bt, 8H)
            i = sigm(g[:, 0 * H2:1 * H2])
            f = sigm(g[:, 1 * H2:2 * H2])
            gg = jnp.tanh(g[:, 2 * H2:3 * H2])
            o = sigm(g[:, 3 * H2:4 * H2])
            c_new = f * c + i * gg
            h_new = (o * jnp.tanh(c_new)).astype(jnp.bfloat16)
            goff = pl.multiple_of(row0 + loc, Bt)
            hs_sc[pl.ds(goff, Bt), :] = h_new
            return (h_new, c_new)

        return lax.fori_loop(0, t_chunk, step, (h, c),
                             unroll=max(1, min(8, t_chunk)))

    h0 = jnp.zeros((Bt, H2), jnp.bfloat16)
    c0 = jnp.zeros((Bt, H2), jnp.float32)
    lax.fori_loop(0, n_chunks, chunk_body, (h0, c0))

    # hidden -> input_size projections for both LSTMs in one block-diagonal
    # bf16 MXU matmul; then the elementwise gate and the split block_projection
    # (cat([gated, x]) @ W^T == gated @ W[:, :D]^T + x @ W[:, D:]^T).
    proj = jnp.dot(hs_sc[...], wproj_ref[...],
                   preferred_element_type=jnp.float32) + bproj_ref[...]
    gated = (proj[:, :D] * proj[:, D:]).astype(jnp.bfloat16)
    out = (
        jnp.dot(gated, wbg_ref[...], preferred_element_type=jnp.float32)
        + jnp.dot(x_ref[...], wbx_ref[...], preferred_element_type=jnp.float32)
        + bb_ref[...]
    )
    out_ref[...] = out.astype(out_ref.dtype)


# ----------------------------------------------------------------------------
# Wrapper (all layout plumbing lives here, in plain JAX)
# ----------------------------------------------------------------------------
def _fuse_gatewise(w1, w2):
    """PyTorch (4H, X) ih weights [i;f;g;o] for two LSTMs -> (X, 8H) with
    gate-major fused columns [i1 i2 f1 f2 g1 g2 o1 o2]."""
    H = w1.shape[0] // 4
    cols = []
    for k in range(4):
        cols.append(w1[k * H:(k + 1) * H, :].T)
        cols.append(w2[k * H:(k + 1) * H, :].T)
    return jnp.concatenate(cols, axis=1)


def _fuse_hh(w1, w2):
    """PyTorch (4H, H) hh weights for two LSTMs -> block-diag (2H, 8H) with the
    same gate-major fused column layout (rows 0:H act on h1, rows H:2H on h2)."""
    H = w1.shape[1]
    z = jnp.zeros((H, H), w1.dtype)
    cols = []
    for k in range(4):
        cols.append(jnp.concatenate([w1[k * H:(k + 1) * H, :].T, z], axis=0))
        cols.append(jnp.concatenate([z, w2[k * H:(k + 1) * H, :].T], axis=0))
    return jnp.concatenate(cols, axis=1)


def _fuse_bias(b1, b2):
    H = b1.shape[0] // 4
    parts = []
    for k in range(4):
        parts.append(b1[k * H:(k + 1) * H])
        parts.append(b2[k * H:(k + 1) * H])
    return jnp.concatenate(parts).reshape(1, -1)


def _vmem_limit_bytes():
    # Derive per-generation (v7x has only 64 MiB physical per TensorCore);
    # leave headroom for Mosaic internal scratch + double-buffered blocks.
    try:
        cap = getattr(pltpu.get_tpu_info(), "vmem_capacity_bytes", None)
        if cap:
            return int(min(cap * 3 // 4, 100 * 1024 * 1024))
    except Exception:
        pass
    return 48 * 1024 * 1024


def mulcat_block(x, params, block_b=32):
    """x: (B, T, D) float32.  params: dict of PyTorch-shaped weights."""
    B, T, D = x.shape
    H = params["rnn.weight_hh"].shape[1]

    # Batch block size: multiple of 16 (bf16 sublane packing) so every
    # per-step scratch slice is tile-aligned; capped near the real batch so
    # zero-padded rows don't blow up wasted compute.
    ALIGN = 16
    Bt = max(ALIGN, -(-min(block_b, B) // ALIGN) * ALIGN)
    Bp = -(-B // Bt) * Bt
    nb = Bp // Bt

    # Time-chunk length for the ih gate precompute: keep the per-chunk bf16
    # gates scratch around <= 2 MiB so VMEM stays bounded at production T.
    Tc = max(1, min(T, (2 * 1024 * 1024) // max(1, Bt * 8 * H * 2)))
    Tp = -(-T // Tc) * Tc
    n_chunks = Tp // Tc
    del n_chunks  # derived again inside the kernel

    # Pad batch and time with zeros (trailing pad steps don't affect earlier
    # outputs of a forward LSTM; padded rows/steps are dropped at the end).
    xp = jnp.pad(x, ((0, Bp - B), (0, Tp - T), (0, 0)))
    # (Bp,T,D) -> (nb, Bt, Tp, D) -> time-major per block -> flat (nb, Tp*Bt, D)
    x_blk = (xp.reshape(nb, Bt, Tp, D)
               .transpose(0, 2, 1, 3)
               .reshape(nb, Tp * Bt, D)
               .astype(jnp.bfloat16))

    # ---- fused / pre-transposed weights (kernel only does row-major x @ W) --
    wih = _fuse_gatewise(params["rnn.weight_ih"],
                         params["gate_rnn.weight_ih"]).astype(jnp.bfloat16)
    b_cat = _fuse_bias(params["rnn.bias_ih"] + params["rnn.bias_hh"],
                       params["gate_rnn.bias_ih"] + params["gate_rnn.bias_hh"]
                       ).astype(jnp.float32)                       # (1, 8H)
    whh = _fuse_hh(params["rnn.weight_hh"],
                   params["gate_rnn.weight_hh"]).astype(jnp.bfloat16)  # (2H, 8H)

    wproj = jnp.zeros((2 * H, 2 * D), jnp.float32)
    wproj = wproj.at[:H, :D].set(params["rnn_proj.weight"].T)
    wproj = wproj.at[H:, D:].set(params["gate_rnn_proj.weight"].T)
    wproj = wproj.astype(jnp.bfloat16)                             # (2H, 2D)
    bproj = jnp.concatenate([params["rnn_proj.bias"],
                             params["gate_rnn_proj.bias"]]
                            ).reshape(1, -1).astype(jnp.float32)   # (1, 2D)

    wb = params["block_projection.weight"]                         # (D, 2D)
    wbg = wb[:, :D].T.astype(jnp.bfloat16)                         # (D, D)
    wbx = wb[:, D:].T.astype(jnp.bfloat16)                         # (D, D)
    bb = params["block_projection.bias"].reshape(1, -1).astype(jnp.float32)

    def full_spec(arr):
        return pl.BlockSpec(arr.shape, lambda b: (0, 0))

    kernel = functools.partial(_mulcat_kernel, t_pad=Tp, t_chunk=Tc)

    out = pl.pallas_call(
        kernel,
        out_shape=jax.ShapeDtypeStruct((nb, Tp * Bt, D), jnp.float32),
        grid=(nb,),
        in_specs=[
            pl.BlockSpec((None, Tp * Bt, D), lambda b: (b, 0, 0)),  # x block
            full_spec(wih), full_spec(b_cat), full_spec(whh),
            full_spec(wproj), full_spec(bproj),
            full_spec(wbg), full_spec(wbx), full_spec(bb),
        ],
        out_specs=pl.BlockSpec((None, Tp * Bt, D), lambda b: (b, 0, 0)),
        scratch_shapes=[
            pltpu.VMEM((Tc * Bt, 8 * H), jnp.bfloat16),   # per-chunk ih gates
            pltpu.VMEM((Tp * Bt, 2 * H), jnp.bfloat16),   # fused hidden states
        ],
        compiler_params=pltpu.CompilerParams(
            dimension_semantics=("parallel",),
            vmem_limit_bytes=_vmem_limit_bytes(),
        ),
    )(x_blk, wih, b_cat, whh, wproj, bproj, wbg, wbx, bb)

    # Back to (B, T, D), dropping batch/time padding.
    out = (out.reshape(nb, Tp, Bt, D)
              .transpose(0, 2, 1, 3)
              .reshape(Bp, Tp, D))
    return out[:B, :T]


# ----------------------------------------------------------------------------
# Pure-JAX reference (mirrors the PyTorch forward exactly, f32 everywhere)
# ----------------------------------------------------------------------------
def _lstm_ref(x, wih, whh, bih, bhh):
    B, T, D = x.shape
    H = whh.shape[1]

    def step(carry, xt):
        h, c = carry
        g = xt @ wih.T + bih + h @ whh.T + bhh
        i, f, gg, o = jnp.split(g, 4, axis=-1)
        i, f, o = jax.nn.sigmoid(i), jax.nn.sigmoid(f), jax.nn.sigmoid(o)
        gg = jnp.tanh(gg)
        c = f * c + i * gg
        h = o * jnp.tanh(c)
        return (h, c), h

    init = (jnp.zeros((B, H), jnp.float32), jnp.zeros((B, H), jnp.float32))
    _, hs = lax.scan(step, init, jnp.transpose(x, (1, 0, 2)))
    return jnp.transpose(hs, (1, 0, 2))           # (B, T, H)


def mulcat_block_ref(x, p):
    B, T, D = x.shape
    r = _lstm_ref(x, p["rnn.weight_ih"], p["rnn.weight_hh"],
                  p["rnn.bias_ih"], p["rnn.bias_hh"])
    r = r.reshape(-1, r.shape[-1]) @ p["rnn_proj.weight"].T + p["rnn_proj.bias"]
    r = r.reshape(B, T, D)
    g = _lstm_ref(x, p["gate_rnn.weight_ih"], p["gate_rnn.weight_hh"],
                  p["gate_rnn.bias_ih"], p["gate_rnn.bias_hh"])
    g = g.reshape(-1, g.shape[-1]) @ p["gate_rnn_proj.weight"].T \
        + p["gate_rnn_proj.bias"]
    g = g.reshape(B, T, D)
    gated = jnp.concatenate([r * g, x], axis=2)
    out = gated.reshape(-1, 2 * D) @ p["block_projection.weight"].T \
        + p["block_projection.bias"]
    return out.reshape(B, T, D)


# ----------------------------------------------------------------------------
# Deterministic parameter init (PyTorch-shaped tensors)
# ----------------------------------------------------------------------------
def init_params(key, input_size, hidden_size):
    D, H = input_size, hidden_size
    bound = 1.0 / jnp.sqrt(H)
    shapes = {
        "rnn.weight_ih": (4 * H, D), "rnn.weight_hh": (4 * H, H),
        "rnn.bias_ih": (4 * H,), "rnn.bias_hh": (4 * H,),
        "rnn_proj.weight": (D, H), "rnn_proj.bias": (D,),
        "gate_rnn.weight_ih": (4 * H, D), "gate_rnn.weight_hh": (4 * H, H),
        "gate_rnn.bias_ih": (4 * H,), "gate_rnn.bias_hh": (4 * H,),
        "gate_rnn_proj.weight": (D, H), "gate_rnn_proj.bias": (D,),
        "block_projection.weight": (D, 2 * D), "block_projection.bias": (D,),
    }
    params = {}
    for name, shape in shapes.items():
        key, sub = jax.random.split(key)
        params[name] = jax.random.uniform(
            sub, shape, jnp.float32, minval=-bound, maxval=bound)
    return params


# ----------------------------------------------------------------------------
if __name__ == "__main__":
    B, T = 2, 8              # batch, sequence length
    input_size, hidden_size = 16, 32

    key = jax.random.PRNGKey(0)
    key, kx = jax.random.split(key)
    x = jax.random.normal(kx, (B, T, input_size), jnp.float32)
    params = init_params(key, input_size, hidden_size)

    out = jax.block_until_ready(mulcat_block(x, params))
    ref = jax.block_until_ready(mulcat_block_ref(x, params))

    assert out.shape == (B, T, input_size)
    # bf16 operands / bf16 scratch on the throughput paths => relaxed tolerance.
    err = float(jnp.max(jnp.abs(out - ref)))
    assert jnp.allclose(out, ref, rtol=3e-2, atol=3e-2), f"max abs err {err}"
    print("KERNEL_OK")
</pallas_src>

<mosaic_0001>
module attributes {stable_mosaic.version = 11 : i64} {
  func.func @_mulcat_kernel(%arg0: i32, %arg1: memref<1x128x16xbf16, #tpu.memory_space<vmem>>, %arg2: memref<16x256xbf16, #tpu.memory_space<vmem>>, %arg3: memref<1x256xf32, #tpu.memory_space<vmem>>, %arg4: memref<64x256xbf16, #tpu.memory_space<vmem>>, %arg5: memref<64x32xbf16, #tpu.memory_space<vmem>>, %arg6: memref<1x32xf32, #tpu.memory_space<vmem>>, %arg7: memref<16x16xbf16, #tpu.memory_space<vmem>>, %arg8: memref<16x16xbf16, #tpu.memory_space<vmem>>, %arg9: memref<1x16xf32, #tpu.memory_space<vmem>>, %arg10: memref<1x128x16xf32, #tpu.memory_space<vmem>>, %arg11: memref<128x256xbf16, #tpu.memory_space<vmem>>, %arg12: memref<128x64xbf16, #tpu.memory_space<vmem>>) attributes {dimension_semantics = [#tpu.dimension_semantics<parallel>], iteration_bounds = array<i64: 1>, scalar_prefetch = 0 : i64, scratch_operands = 2 : i64, tpu.core_type = #tpu.core_type<tc>, window_params = [{transform_indices = @transform_0, window_bounds = array<i64: 1, 128, 16>}, {pipeline_mode = #tpu.pipeline_mode<synchronous>, transform_indices = @transform_1, window_bounds = array<i64: 16, 256>}, {pipeline_mode = #tpu.pipeline_mode<synchronous>, transform_indices = @transform_2, window_bounds = array<i64: 1, 256>}, {pipeline_mode = #tpu.pipeline_mode<synchronous>, transform_indices = @transform_3, window_bounds = array<i64: 64, 256>}, {pipeline_mode = #tpu.pipeline_mode<synchronous>, transform_indices = @transform_4, window_bounds = array<i64: 64, 32>}, {pipeline_mode = #tpu.pipeline_mode<synchronous>, transform_indices = @transform_5, window_bounds = array<i64: 1, 32>}, {pipeline_mode = #tpu.pipeline_mode<synchronous>, transform_indices = @transform_6, window_bounds = array<i64: 16, 16>}, {pipeline_mode = #tpu.pipeline_mode<synchronous>, transform_indices = @transform_7, window_bounds = array<i64: 16, 16>}, {pipeline_mode = #tpu.pipeline_mode<synchronous>, transform_indices = @transform_8, window_bounds = array<i64: 1, 16>}, {transform_indices = @transform_9, window_bounds = array<i64: 1, 128, 16>}]} {
    %c0 = arith.constant 0 : index
    %c0_0 = arith.constant 0 : index
    %0 = vector.load %arg2[%c0, %c0_0] : memref<16x256xbf16, #tpu.memory_space<vmem>>, vector<16x256xbf16>
    %c0_1 = arith.constant 0 : index
    %c0_2 = arith.constant 0 : index
    %1 = vector.load %arg4[%c0_1, %c0_2] : memref<64x256xbf16, #tpu.memory_space<vmem>>, vector<64x256xbf16>
    %c0_3 = arith.constant 0 : index
    %c0_4 = arith.constant 0 : index
    %2 = vector.load %arg3[%c0_3, %c0_4] : memref<1x256xf32, #tpu.memory_space<vmem>>, vector<1x256xf32>
    %cst = arith.constant 0.000000e+00 : bf16
    %3 = vector.broadcast %cst : bf16 to vector<16x64xbf16>
    %cst_5 = arith.constant 0.000000e+00 : f32
    %4 = vector.broadcast %cst_5 : f32 to vector<16x64xf32>
    %c0_i32 = arith.constant 0 : i32
    %c128_i32 = arith.constant 128 : i32
    %5 = arith.muli %c0_i32, %c128_i32 : i32
    %6 = tpu.assume_multiple %5, 128 : i32
    %c0_6 = arith.constant 0 : index
    %7 = arith.index_cast %6 : i32 to index
    %c0_7 = arith.constant 0 : index
    %8 = vector.load %arg1[%c0_6, %7, %c0_7] : memref<1x128x16xbf16, #tpu.memory_space<vmem>>, vector<1x128x16xbf16>
    %9 = vector.shape_cast %8 : vector<1x128x16xbf16> to vector<128x16xbf16>
    %cst_8 = arith.constant dense<0.000000e+00> : vector<128x256xf32>
    %10 = tpu.matmul %9, %0, %cst_8 {dimension_numbers = #tpu.dot_dimension_numbers<[1], [0], [0], [1], [0, 0, 1, 1], [], []>} : vector<128x16xbf16>, vector<16x256xbf16>, vector<128x256xf32> -> vector<128x256xf32>
    %11 = vector.broadcast %2 : vector<1x256xf32> to vector<128x256xf32>
    %12 = arith.addf %10, %11 : vector<128x256xf32>
    %13 = arith.truncf %12 : vector<128x256xf32> to vector<128x256xbf16>
    %c0_9 = arith.constant 0 : index
    %c0_10 = arith.constant 0 : index
    %14 = vector.load %arg11[%c0_9, %c0_10] : memref<128x256xbf16, #tpu.memory_space<vmem>>, vector<128x256xbf16>
    tpu.vector_store %arg11[%c0_9, %c0_10], %13 {strides = array<i32>} : memref<128x256xbf16, #tpu.memory_space<vmem>>, vector<128x256xbf16>,
    %c0_i32_11 = arith.constant 0 : i32
    %c16_i32 = arith.constant 16 : i32
    %15 = arith.muli %c0_i32_11, %c16_i32 : i32
    %16 = tpu.assume_multiple %15, 16 : i32
    %17 = arith.index_cast %16 : i32 to index
    %c0_12 = arith.constant 0 : index
    %18 = vector.load %arg11[%17, %c0_12] : memref<128x256xbf16, #tpu.memory_space<vmem>>, vector<16x256xbf16>
    %19 = arith.extf %18 : vector<16x256xbf16> to vector<16x256xf32>
    %cst_13 = arith.constant dense<0.000000e+00> : vector<16x256xf32>
    %20 = tpu.matmul %3, %1, %cst_13 {dimension_numbers = #tpu.dot_dimension_numbers<[1], [0], [0], [1], [0, 0, 1, 1], [], []>} : vector<16x64xbf16>, vector<64x256xbf16>, vector<16x256xf32> -> vector<16x256xf32>
    %21 = arith.addf %19, %20 : vector<16x256xf32>
    %22 = vector.extract_strided_slice %21 {offsets = [0, 0], sizes = [16, 64], strides = [1, 1]} : vector<16x256xf32> to vector<16x64xf32>
    %cst_14 = arith.constant 5.000000e-01 : f32
    %23 = vector.broadcast %cst_14 : f32 to vector<16x64xf32>
    %24 = arith.mulf %23, %22 : vector<16x64xf32>
    %25 = math.tanh %24 : vector<16x64xf32>
    %cst_15 = arith.constant 5.000000e-01 : f32
    %26 = vector.broadcast %cst_15 : f32 to vector<16x64xf32>
    %27 = arith.mulf %26, %25 : vector<16x64xf32>
    %cst_16 = arith.constant 5.000000e-01 : f32
    %28 = vector.broadcast %cst_16 : f32 to vector<16x64xf32>
    %29 = arith.addf %27, %28 : vector<16x64xf32>
    %30 = vector.extract_strided_slice %21 {offsets = [0, 64], sizes = [16, 64], strides = [1, 1]} : vector<16x256xf32> to vector<16x64xf32>
    %cst_17 = arith.constant 5.000000e-01 : f32
    %31 = vector.broadcast %cst_17 : f32 to vector<16x64xf32>
    %32 = arith.mulf %31, %30 : vector<16x64xf32>
    %33 = math.tanh %32 : vector<16x64xf32>
    %cst_18 = arith.constant 5.000000e-01 : f32
    %34 = vector.broadcast %cst_18 : f32 to vector<16x64xf32>
    %35 = arith.mulf %34, %33 : vector<16x64xf32>
    %cst_19 = arith.constant 5.000000e-01 : f32
    %36 = vector.broadcast %cst_19 : f32 to vector<16x64xf32>
    %37 = arith.addf %35, %36 : vector<16x64xf32>
    %38 = vector.extract_strided_slice %21 {offsets = [0, 128], sizes = [16, 64], strides = [1, 1]} : vector<16x256xf32> to vector<16x64xf32>
    %39 = math.tanh %38 : vector<16x64xf32>
    %40 = vector.extract_strided_slice %21 {offsets = [0, 192], sizes = [16, 64], strides = [1, 1]} : vector<16x256xf32> to vector<16x64xf32>
    %cst_20 = arith.constant 5.000000e-01 : f32
    %41 = vector.broadcast %cst_20 : f32 to vector<16x64xf32>
    %42 = arith.mulf %41, %40 : vector<16x64xf32>
    %43 = math.tanh %42 : vector<16x64xf32>
    %cst_21 = arith.constant 5.000000e-01 : f32
    %44 = vector.broadcast %cst_21 : f32 to vector<16x64xf32>
    %45 = arith.mulf %44, %43 : vector<16x64xf32>
    %cst_22 = arith.constant 5.000000e-01 : f32
    %46 = vector.broadcast %cst_22 : f32 to vector<16x64xf32>
    %47 = arith.addf %45, %46 : vector<16x64xf32>
    %48 = arith.mulf %37, %4 : vector<16x64xf32>
    %49 = arith.mulf %29, %39 : vector<16x64xf32>
    %50 = arith.addf %48, %49 : vector<16x64xf32>
    %51 = math.tanh %50 : vector<16x64xf32>
    %52 = arith.mulf %47, %51 : vector<16x64xf32>
    %53 = arith.truncf %52 : vector<16x64xf32> to vector<16x64xbf16>
    %54 = arith.addi %6, %16 : i32
    %55 = tpu.assume_multiple %54, 16 : i32
    %56 = arith.index_cast %55 : i32 to index
    %c0_23 = arith.constant 0 : index
    %57 = vector.load %arg12[%56, %c0_23] : memref<128x64xbf16, #tpu.memory_space<vmem>>, vector<16x64xbf16>
    tpu.vector_store %arg12[%56, %c0_23], %53 {strides = array<i32>} : memref<128x64xbf16, #tpu.memory_space<vmem>>, vector<16x64xbf16>,
    %c1_i32 = arith.constant 1 : i32
    %c16_i32_24 = arith.constant 16 : i32
    %58 = arith.muli %c1_i32, %c16_i32_24 : i32
    %59 = tpu.assume_multiple %58, 16 : i32
    %60 = arith.index_cast %59 : i32 to index
    %c0_25 = arith.constant 0 : index
    %61 = vector.load %arg11[%60, %c0_25] : memref<128x256xbf16, #tpu.memory_space<vmem>>, vector<16x256xbf16>
    %62 = arith.extf %61 : vector<16x256xbf16> to vector<16x256xf32>
    %cst_26 = arith.constant dense<0.000000e+00> : vector<16x256xf32>
    %63 = tpu.matmul %53, %1, %cst_26 {dimension_numbers = #tpu.dot_dimension_numbers<[1], [0], [0], [1], [0, 0, 1, 1], [], []>} : vector<16x64xbf16>, vector<64x256xbf16>, vector<16x256xf32> -> vector<16x256xf32>
    %64 = arith.addf %62, %63 : vector<16x256xf32>
    %65 = vector.extract_strided_slice %64 {offsets = [0, 0], sizes = [16, 64], strides = [1, 1]} : vector<16x256xf32> to vector<16x64xf32>
    %cst_27 = arith.constant 5.000000e-01 : f32
    %66 = vector.broadcast %cst_27 : f32 to vector<16x64xf32>
    %67 = arith.mulf %66, %65 : vector<16x64xf32>
    %68 = math.tanh %67 : vector<16x64xf32>
    %cst_28 = arith.constant 5.000000e-01 : f32
    %69 = vector.broadcast %cst_28 : f32 to vector<16x64xf32>
    %70 = arith.mulf %69, %68 : vector<16x64xf32>
    %cst_29 = arith.constant 5.000000e-01 : f32
    %71 = vector.broadcast %cst_29 : f32 to vector<16x64xf32>
    %72 = arith.addf %70, %71 : vector<16x64xf32>
    %73 = vector.extract_strided_slice %64 {offsets = [0, 64], sizes = [16, 64], strides = [1, 1]} : vector<16x256xf32> to vector<16x64xf32>
    %cst_30 = arith.constant 5.000000e-01 : f32
    %74 = vector.broadcast %cst_30 : f32 to vector<16x64xf32>
    %75 = arith.mulf %74, %73 : vector<16x64xf32>
    %76 = math.tanh %75 : vector<16x64xf32>
    %cst_31 = arith.constant 5.000000e-01 : f32
    %77 = vector.broadcast %cst_31 : f32 to vector<16x64xf32>
    %78 = arith.mulf %77, %76 : vector<16x64xf32>
    %cst_32 = arith.constant 5.000000e-01 : f32
    %79 = vector.broadcast %cst_32 : f32 to vector<16x64xf32>
    %80 = arith.addf %78, %79 : vector<16x64xf32>
    %81 = vector.extract_strided_slice %64 {offsets = [0, 128], sizes = [16, 64], strides = [1, 1]} : vector<16x256xf32> to vector<16x64xf32>
    %82 = math.tanh %81 : vector<16x64xf32>
    %83 = vector.extract_strided_slice %64 {offsets = [0, 192], sizes = [16, 64], strides = [1, 1]} : vector<16x256xf32> to vector<16x64xf32>
    %cst_33 = arith.constant 5.000000e-01 : f32
    %84 = vector.broadcast %cst_33 : f32 to vector<16x64xf32>
    %85 = arith.mulf %84, %83 : vector<16x64xf32>
    %86 = math.tanh %85 : vector<16x64xf32>
    %cst_34 = arith.constant 5.000000e-01 : f32
    %87 = vector.broadcast %cst_34 : f32 to vector<16x64xf32>
    %88 = arith.mulf %87, %86 : vector<16x64xf32>
    %cst_35 = arith.constant 5.000000e-01 : f32
    %89 = vector.broadcast %cst_35 : f32 to vector<16x64xf32>
    %90 = arith.addf %88, %89 : vector<16x64xf32>
    %91 = arith.mulf %80, %50 : vector<16x64xf32>
    %92 = arith.mulf %72, %82 : vector<16x64xf32>
    %93 = arith.addf %91, %92 : vector<16x64xf32>
    %94 = math.tanh %93 : vector<16x64xf32>
    %95 = arith.mulf %90, %94 : vector<16x64xf32>
    %96 = arith.truncf %95 : vector<16x64xf32> to vector<16x64xbf16>
    %97 = arith.addi %6, %59 : i32
    %98 = tpu.assume_multiple %97, 16 : i32
    %99 = arith.index_cast %98 : i32 to index
    %c0_36 = arith.constant 0 : index
    %100 = vector.load %arg12[%99, %c0_36] : memref<128x64xbf16, #tpu.memory_space<vmem>>, vector<16x64xbf16>
    tpu.vector_store %arg12[%99, %c0_36], %96 {strides = array<i32>} : memref<128x64xbf16, #tpu.memory_space<vmem>>, vector<16x64xbf16>,
    %c2_i32 = arith.constant 2 : i32
    %c16_i32_37 = arith.constant 16 : i32
    %101 = arith.muli %c2_i32, %c16_i32_37 : i32
    %102 = tpu.assume_multiple %101, 16 : i32
    %103 = arith.index_cast %102 : i32 to index
    %c0_38 = arith.constant 0 : index
    %104 = vector.load %arg11[%103, %c0_38] : memref<128x256xbf16, #tpu.memory_space<vmem>>, vector<16x256xbf16>
    %105 = arith.extf %104 : vector<16x256xbf16> to vector<16x256xf32>
    %cst_39 = arith.constant dense<0.000000e+00> : vector<16x256xf32>
    %106 = tpu.matmul %96, %1, %cst_39 {dimension_numbers = #tpu.dot_dimension_numbers<[1], [0], [0], [1], [0, 0, 1, 1], [], []>} : vector<16x64xbf16>, vector<64x256xbf16>, vector<16x256xf32> -> vector<16x256xf32>
    %107 = arith.addf %105, %106 : vector<16x256xf32>
    %108 = vector.extract_strided_slice %107 {offsets = [0, 0], sizes = [16, 64], strides = [1, 1]} : vector<16x256xf32> to vector<16x64xf32>
    %cst_40 = arith.constant 5.000000e-01 : f32
    %109 = vector.broadcast %cst_40 : f32 to vector<16x64xf32>
    %110 = arith.mulf %109, %108 : vector<16x64xf32>
    %111 = math.tanh %110 : vector<16x64xf32>
    %cst_41 = arith.constant 5.000000e-01 : f32
    %112 = vector.broadcast %cst_41 : f32 to vector<16x64xf32>
    %113 = arith.mulf %112, %111 : vector<16x64xf32>
    %cst_42 = arith.constant 5.000000e-01 : f32
    %114 = vector.broadcast %cst_42 : f32 to vector<16x64xf32>
    %115 = arith.addf %113, %114 : vector<16x64xf32>
    %116 = vector.extract_strided_slice %107 {offsets = [0, 64], sizes = [16, 64], strides = [1, 1]} : vector<16x256xf32> to vector<16x64xf32>
    %cst_43 = arith.constant 5.000000e-01 : f32
    %117 = vector.broadcast %cst_43 : f32 to vector<16x64xf32>
    %118 = arith.mulf %117, %116 : vector<16x64xf32>
    %119 = math.tanh %118 : vector<16x64xf32>
    %cst_44 = arith.constant 5.000000e-01 : f32
    %120 = vector.broadcast %cst_44 : f32 to vector<16x64xf32>
    %121 = arith.mulf %120, %119 : vector<16x64xf32>
    %cst_45 = arith.constant 5.000000e-01 : f32
    %122 = vector.broadcast %cst_45 : f32 to vector<16x64xf32>
    %123 = arith.addf %121, %122 : vector<16x64xf32>
    %124 = vector.extract_strided_slice %107 {offsets = [0, 128], sizes = [16, 64], strides = [1, 1]} : vector<16x256xf32> to vector<16x64xf32>
    %125 = math.tanh %124 : vector<16x64xf32>
    %126 = vector.extract_strided_slice %107 {offsets = [0, 192], sizes = [16, 64], strides = [1, 1]} : vector<16x256xf32> to vector<16x64xf32>
    %cst_46 = arith.constant 5.000000e-01 : f32
    %127 = vector.broadcast %cst_46 : f32 to vector<16x64xf32>
    %128 = arith.mulf %127, %126 : vector<16x64xf32>
    %129 = math.tanh %128 : vector<16x64xf32>
    %cst_47 = arith.constant 5.000000e-01 : f32
    %130 = vector.broadcast %cst_47 : f32 to vector<16x64xf32>
    %131 = arith.mulf %130, %129 : vector<16x64xf32>
    %cst_48 = arith.constant 5.000000e-01 : f32
    %132 = vector.broadcast %cst_48 : f32 to vector<16x64xf32>
    %133 = arith.addf %131, %132 : vector<16x64xf32>
    %134 = arith.mulf %123, %93 : vector<16x64xf32>
    %135 = arith.mulf %115, %125 : vector<16x64xf32>
    %136 = arith.addf %134, %135 : vector<16x64xf32>
    %137 = math.tanh %136 : vector<16x64xf32>
    %138 = arith.mulf %133, %137 : vector<16x64xf32>
    %139 = arith.truncf %138 : vector<16x64xf32> to vector<16x64xbf16>
    %140 = arith.addi %6, %102 : i32
    %141 = tpu.assume_multiple %140, 16 : i32
    %142 = arith.index_cast %141 : i32 to index
    %c0_49 = arith.constant 0 : index
    %143 = vector.load %arg12[%142, %c0_49] : memref<128x64xbf16, #tpu.memory_space<vmem>>, vector<16x64xbf16>
    tpu.vector_store %arg12[%142, %c0_49], %139 {strides = array<i32>} : memref<128x64xbf16, #tpu.memory_space<vmem>>, vector<16x64xbf16>,
    %c3_i32 = arith.constant 3 : i32
    %c16_i32_50 = arith.constant 16 : i32
    %144 = arith.muli %c3_i32, %c16_i32_50 : i32
    %145 = tpu.assume_multiple %144, 16 : i32
    %146 = arith.index_cast %145 : i32 to index
    %c0_51 = arith.constant 0 : index
    %147 = vector.load %arg11[%146, %c0_51] : memref<128x256xbf16, #tpu.memory_space<vmem>>, vector<16x256xbf16>
    %148 = arith.extf %147 : vector<16x256xbf16> to vector<16x256xf32>
    %cst_52 = arith.constant dense<0.000000e+00> : vector<16x256xf32>
    %149 = tpu.matmul %139, %1, %cst_52 {dimension_numbers = #tpu.dot_dimension_numbers<[1], [0], [0], [1], [0, 0, 1, 1], [], []>} : vector<16x64xbf16>, vector<64x256xbf16>, vector<16x256xf32> -> vector<16x256xf32>
    %150 = arith.addf %148, %149 : vector<16x256xf32>
    %151 = vector.extract_strided_slice %150 {offsets = [0, 0], sizes = [16, 64], strides = [1, 1]} : vector<16x256xf32> to vector<16x64xf32>
    %cst_53 = arith.constant 5.000000e-01 : f32
    %152 = vector.broadcast %cst_53 : f32 to vector<16x64xf32>
    %153 = arith.mulf %152, %151 : vector<16x64xf32>
    %154 = math.tanh %153 : vector<16x64xf32>
    %cst_54 = arith.constant 5.000000e-01 : f32
    %155 = vector.broadcast %cst_54 : f32 to vector<16x64xf32>
    %156 = arith.mulf %155, %154 : vector<16x64xf32>
    %cst_55 = arith.constant 5.000000e-01 : f32
    %157 = vector.broadcast %cst_55 : f32 to vector<16x64xf32>
    %158 = arith.addf %156, %157 : vector<16x64xf32>
    %159 = vector.extract_strided_slice %150 {offsets = [0, 64], sizes = [16, 64], strides = [1, 1]} : vector<16x256xf32> to vector<16x64xf32>
    %cst_56 = arith.constant 5.000000e-01 : f32
    %160 = vector.broadcast %cst_56 : f32 to vector<16x64xf32>
    %161 = arith.mulf %160, %159 : vector<16x64xf32>
    %162 = math.tanh %161 : vector<16x64xf32>
    %cst_57 = arith.constant 5.000000e-01 : f32
    %163 = vector.broadcast %cst_57 : f32 to vector<16x64xf32>
    %164 = arith.mulf %163, %162 : vector<16x64xf32>
    %cst_58 = arith.constant 5.000000e-01 : f32
    %165 = vector.broadcast %cst_58 : f32 to vector<16x64xf32>
    %166 = arith.addf %164, %165 : vector<16x64xf32>
    %167 = vector.extract_strided_slice %150 {offsets = [0, 128], sizes = [16, 64], strides = [1, 1]} : vector<16x256xf32> to vector<16x64xf32>
    %168 = math.tanh %167 : vector<16x64xf32>
    %169 = vector.extract_strided_slice %150 {offsets = [0, 192], sizes = [16, 64], strides = [1, 1]} : vector<16x256xf32> to vector<16x64xf32>
    %cst_59 = arith.constant 5.000000e-01 : f32
    %170 = vector.broadcast %cst_59 : f32 to vector<16x64xf32>
    %171 = arith.mulf %170, %169 : vector<16x64xf32>
    %172 = math.tanh %171 : vector<16x64xf32>
    %cst_60 = arith.constant 5.000000e-01 : f32
    %173 = vector.broadcast %cst_60 : f32 to vector<16x64xf32>
    %174 = arith.mulf %173, %172 : vector<16x64xf32>
    %cst_61 = arith.constant 5.000000e-01 : f32
    %175 = vector.broadcast %cst_61 : f32 to vector<16x64xf32>
    %176 = arith.addf %174, %175 : vector<16x64xf32>
    %177 = arith.mulf %166, %136 : vector<16x64xf32>
    %178 = arith.mulf %158, %168 : vector<16x64xf32>
    %179 = arith.addf %177, %178 : vector<16x64xf32>
    %180 = math.tanh %179 : vector<16x64xf32>
    %181 = arith.mulf %176, %180 : vector<16x64xf32>
    %182 = arith.truncf %181 : vector<16x64xf32> to vector<16x64xbf16>
    %183 = arith.addi %6, %145 : i32
    %184 = tpu.assume_multiple %183, 16 : i32
    %185 = arith.index_cast %184 : i32 to index
    %c0_62 = arith.constant 0 : index
    %186 = vector.load %arg12[%185, %c0_62] : memref<128x64xbf16, #tpu.memory_space<vmem>>, vector<16x64xbf16>
    tpu.vector_store %arg12[%185, %c0_62], %182 {strides = array<i32>} : memref<128x64xbf16, #tpu.memory_space<vmem>>, vector<16x64xbf16>,
    %c4_i32 = arith.constant 4 : i32
    %c16_i32_63 = arith.constant 16 : i32
    %187 = arith.muli %c4_i32, %c16_i32_63 : i32
    %188 = tpu.assume_multiple %187, 16 : i32
    %189 = arith.index_cast %188 : i32 to index
    %c0_64 = arith.constant 0 : index
    %190 = vector.load %arg11[%189, %c0_64] : memref<128x256xbf16, #tpu.memory_space<vmem>>, vector<16x256xbf16>
    %191 = arith.extf %190 : vector<16x256xbf16> to vector<16x256xf32>
    %cst_65 = arith.constant dense<0.000000e+00> : vector<16x256xf32>
    %192 = tpu.matmul %182, %1, %cst_65 {dimension_numbers = #tpu.dot_dimension_numbers<[1], [0], [0], [1], [0, 0, 1, 1], [], []>} : vector<16x64xbf16>, vector<64x256xbf16>, vector<16x256xf32> -> vector<16x256xf32>
    %193 = arith.addf %191, %192 : vector<16x256xf32>
    %194 = vector.extract_strided_slice %193 {offsets = [0, 0], sizes = [16, 64], strides = [1, 1]} : vector<16x256xf32> to vector<16x64xf32>
    %cst_66 = arith.constant 5.000000e-01 : f32
    %195 = vector.broadcast %cst_66 : f32 to vector<16x64xf32>
    %196 = arith.mulf %195, %194 : vector<16x64xf32>
    %197 = math.tanh %196 : vector<16x64xf32>
    %cst_67 = arith.constant 5.000000e-01 : f32
    %198 = vector.broadcast %cst_67 : f32 to vector<16x64xf32>
    %199 = arith.mulf %198, %197 : vector<16x64xf32>
    %cst_68 = arith.constant 5.000000e-01 : f32
    %200 = vector.broadcast %cst_68 : f32 to vector<16x64xf32>
    %201 = arith.addf %199, %200 : vector<16x64xf32>
    %202 = vector.extract_strided_slice %193 {offsets = [0, 64], sizes = [16, 64], strides = [1, 1]} : vector<16x256xf32> to vector<16x64xf32>
    %cst_69 = arith.constant 5.000000e-01 : f32
    %203 = vector.broadcast %cst_69 : f32 to vector<16x64xf32>
    %204 = arith.mulf %203, %202 : vector<16x64xf32>
    %205 = math.tanh %204 : vector<16x64xf32>
    %cst_70 = arith.constant 5.000000e-01 : f32
    %206 = vector.broadcast %cst_70 : f32 to vector<16x64xf32>
    %207 = arith.mulf %206, %205 : vector<16x64xf32>
    %cst_71 = arith.constant 5.000000e-01 : f32
    %208 = vector.broadcast %cst_71 : f32 to vector<16x64xf32>
    %209 = arith.addf %207, %208 : vector<16x64xf32>
    %210 = vector.extract_strided_slice %193 {offsets = [0, 128], sizes = [16, 64], strides = [1, 1]} : vector<16x256xf32> to vector<16x64xf32>
    %211 = math.tanh %210 : vector<16x64xf32>
    %212 = vector.extract_strided_slice %193 {offsets = [0, 192], sizes = [16, 64], strides = [1, 1]} : vector<16x256xf32> to vector<16x64xf32>
    %cst_72 = arith.constant 5.000000e-01 : f32
    %213 = vector.broadcast %cst_72 : f32 to vector<16x64xf32>
    %214 = arith.mulf %213, %212 : vector<16x64xf32>
    %215 = math.tanh %214 : vector<16x64xf32>
    %cst_73 = arith.constant 5.000000e-01 : f32
    %216 = vector.broadcast %cst_73 : f32 to vector<16x64xf32>
    %217 = arith.mulf %216, %215 : vector<16x64xf32>
    %cst_74 = arith.constant 5.000000e-01 : f32
    %218 = vector.broadcast %cst_74 : f32 to vector<16x64xf32>
    %219 = arith.addf %217, %218 : vector<16x64xf32>
    %220 = arith.mulf %209, %179 : vector<16x64xf32>
    %221 = arith.mulf %201, %211 : vector<16x64xf32>
    %222 = arith.addf %220, %221 : vector<16x64xf32>
    %223 = math.tanh %222 : vector<16x64xf32>
    %224 = arith.mulf %219, %223 : vector<16x64xf32>
    %225 = arith.truncf %224 : vector<16x64xf32> to vector<16x64xbf16>
    %226 = arith.addi %6, %188 : i32
    %227 = tpu.assume_multiple %226, 16 : i32
    %228 = arith.index_cast %227 : i32 to index
    %c0_75 = arith.constant 0 : index
    %229 = vector.load %arg12[%228, %c0_75] : memref<128x64xbf16, #tpu.memory_space<vmem>>, vector<16x64xbf16>
    tpu.vector_store %arg12[%228, %c0_75], %225 {strides = array<i32>} : memref<128x64xbf16, #tpu.memory_space<vmem>>, vector<16x64xbf16>,
    %c5_i32 = arith.constant 5 : i32
    %c16_i32_76 = arith.constant 16 : i32
    %230 = arith.muli %c5_i32, %c16_i32_76 : i32
    %231 = tpu.assume_multiple %230, 16 : i32
    %232 = arith.index_cast %231 : i32 to index
    %c0_77 = arith.constant 0 : index
    %233 = vector.load %arg11[%232, %c0_77] : memref<128x256xbf16, #tpu.memory_space<vmem>>, vector<16x256xbf16>
    %234 = arith.extf %233 : vector<16x256xbf16> to vector<16x256xf32>
    %cst_78 = arith.constant dense<0.000000e+00> : vector<16x256xf32>
    %235 = tpu.matmul %225, %1, %cst_78 {dimension_numbers = #tpu.dot_dimension_numbers<[1], [0], [0], [1], [0, 0, 1, 1], [], []>} : vector<16x64xbf16>, vector<64x256xbf16>, vector<16x256xf32> -> vector<16x256xf32>
    %236 = arith.addf %234, %235 : vector<16x256xf32>
    %237 = vector.extract_strided_slice %236 {offsets = [0, 0], sizes = [16, 64], strides = [1, 1]} : vector<16x256xf32> to vector<16x64xf32>
    %cst_79 = arith.constant 5.000000e-01 : f32
    %238 = vector.broadcast %cst_79 : f32 to vector<16x64xf32>
    %239 = arith.mulf %238, %237 : vector<16x64xf32>
    %240 = math.tanh %239 : vector<16x64xf32>
    %cst_80 = arith.constant 5.000000e-01 : f32
    %241 = vector.broadcast %cst_80 : f32 to vector<16x64xf32>
    %242 = arith.mulf %241, %240 : vector<16x64xf32>
    %cst_81 = arith.constant 5.000000e-01 : f32
    %243 = vector.broadcast %cst_81 : f32 to vector<16x64xf32>
    %244 = arith.addf %242, %243 : vector<16x64xf32>
    %245 = vector.extract_strided_slice %236 {offsets = [0, 64], sizes = [16, 64], strides = [1, 1]} : vector<16x256xf32> to vector<16x64xf32>
    %cst_82 = arith.constant 5.000000e-01 : f32
    %246 = vector.broadcast %cst_82 : f32 to vector<16x64xf32>
    %247 = arith.mulf %246, %245 : vector<16x64xf32>
    %248 = math.tanh %247 : vector<16x64xf32>
    %cst_83 = arith.constant 5.000000e-01 : f32
    %249 = vector.broadcast %cst_83 : f32 to vector<16x64xf32>
    %250 = arith.mulf %249, %248 : vector<16x64xf32>
    %cst_84 = arith.constant 5.000000e-01 : f32
    %251 = vector.broadcast %cst_84 : f32 to vector<16x64xf32>
    %252 = arith.addf %250, %251 : vector<16x64xf32>
    %253 = vector.extract_strided_slice %236 {offsets = [0, 128], sizes = [16, 64], strides = [1, 1]} : vector<16x256xf32> to vector<16x64xf32>
    %254 = math.tanh %253 : vector<16x64xf32>
    %255 = vector.extract_strided_slice %236 {offsets = [0, 192], sizes = [16, 64], strides = [1, 1]} : vector<16x256xf32> to vector<16x64xf32>
    %cst_85 = arith.constant 5.000000e-01 : f32
    %256 = vector.broadcast %cst_85 : f32 to vector<16x64xf32>
    %257 = arith.mulf %256, %255 : vector<16x64xf32>
    %258 = math.tanh %257 : vector<16x64xf32>
    %cst_86 = arith.constant 5.000000e-01 : f32
    %259 = vector.broadcast %cst_86 : f32 to vector<16x64xf32>
    %260 = arith.mulf %259, %258 : vector<16x64xf32>
    %cst_87 = arith.constant 5.000000e-01 : f32
    %261 = vector.broadcast %cst_87 : f32 to vector<16x64xf32>
    %262 = arith.addf %260, %261 : vector<16x64xf32>
    %263 = arith.mulf %252, %222 : vector<16x64xf32>
    %264 = arith.mulf %244, %254 : vector<16x64xf32>
    %265 = arith.addf %263, %264 : vector<16x64xf32>
    %266 = math.tanh %265 : vector<16x64xf32>
    %267 = arith.mulf %262, %266 : vector<16x64xf32>
    %268 = arith.truncf %267 : vector<16x64xf32> to vector<16x64xbf16>
    %269 = arith.addi %6, %231 : i32
    %270 = tpu.assume_multiple %269, 16 : i32
    %271 = arith.index_cast %270 : i32 to index
    %c0_88 = arith.constant 0 : index
    %272 = vector.load %arg12[%271, %c0_88] : memref<128x64xbf16, #tpu.memory_space<vmem>>, vector<16x64xbf16>
    tpu.vector_store %arg12[%271, %c0_88], %268 {strides = array<i32>} : memref<128x64xbf16, #tpu.memory_space<vmem>>, vector<16x64xbf16>,
    %c6_i32 = arith.constant 6 : i32
    %c16_i32_89 = arith.constant 16 : i32
    %273 = arith.muli %c6_i32, %c16_i32_89 : i32
    %274 = tpu.assume_multiple %273, 16 : i32
    %275 = arith.index_cast %274 : i32 to index
    %c0_90 = arith.constant 0 : index
    %276 = vector.load %arg11[%275, %c0_90] : memref<128x256xbf16, #tpu.memory_space<vmem>>, vector<16x256xbf16>
    %277 = arith.extf %276 : vector<16x256xbf16> to vector<16x256xf32>
    %cst_91 = arith.constant dense<0.000000e+00> : vector<16x256xf32>
    %278 = tpu.matmul %268, %1, %cst_91 {dimension_numbers = #tpu.dot_dimension_numbers<[1], [0], [0], [1], [0, 0, 1, 1], [], []>} : vector<16x64xbf16>, vector<64x256xbf16>, vector<16x256xf32> -> vector<16x256xf32>
    %279 = arith.addf %277, %278 : vector<16x256xf32>
    %280 = vector.extract_strided_slice %279 {offsets = [0, 0], sizes = [16, 64], strides = [1, 1]} : vector<16x256xf32> to vector<16x64xf32>
    %cst_92 = arith.constant 5.000000e-01 : f32
    %281 = vector.broadcast %cst_92 : f32 to vector<16x64xf32>
    %282 = arith.mulf %281, %280 : vector<16x64xf32>
    %283 = math.tanh %282 : vector<16x64xf32>
    %cst_93 = arith.constant 5.000000e-01 : f32
    %284 = vector.broadcast %cst_93 : f32 to vector<16x64xf32>
    %285 = arith.mulf %284, %283 : vector<16x64xf32>
    %cst_94 = arith.constant 5.000000e-01 : f32
    %286 = vector.broadcast %cst_94 : f32 to vector<16x64xf32>
    %287 = arith.addf %285, %286 : vector<16x64xf32>
    %288 = vector.extract_strided_slice %279 {offsets = [0, 64], sizes = [16, 64], strides = [1, 1]} : vector<16x256xf32> to vector<16x64xf32>
    %cst_95 = arith.constant 5.000000e-01 : f32
    %289 = vector.broadcast %cst_95 : f32 to vector<16x64xf32>
    %290 = arith.mulf %289, %288 : vector<16x64xf32>
    %291 = math.tanh %290 : vector<16x64xf32>
    %cst_96 = arith.constant 5.000000e-01 : f32
    %292 = vector.broadcast %cst_96 : f32 to vector<16x64xf32>
    %293 = arith.mulf %292, %291 : vector<16x64xf32>
    %cst_97 = arith.constant 5.000000e-01 : f32
    %294 = vector.broadcast %cst_97 : f32 to vector<16x64xf32>
    %295 = arith.addf %293, %294 : vector<16x64xf32>
    %296 = vector.extract_strided_slice %279 {offsets = [0, 128], sizes = [16, 64], strides = [1, 1]} : vector<16x256xf32> to vector<16x64xf32>
    %297 = math.tanh %296 : vector<16x64xf32>
    %298 = vector.extract_strided_slice %279 {offsets = [0, 192], sizes = [16, 64], strides = [1, 1]} : vector<16x256xf32> to vector<16x64xf32>
    %cst_98 = arith.constant 5.000000e-01 : f32
    %299 = vector.broadcast %cst_98 : f32 to vector<16x64xf32>
    %300 = arith.mulf %299, %298 : vector<16x64xf32>
    %301 = math.tanh %300 : vector<16x64xf32>
    %cst_99 = arith.constant 5.000000e-01 : f32
    %302 = vector.broadcast %cst_99 : f32 to vector<16x64xf32>
    %303 = arith.mulf %302, %301 : vector<16x64xf32>
    %cst_100 = arith.constant 5.000000e-01 : f32
    %304 = vector.broadcast %cst_100 : f32 to vector<16x64xf32>
    %305 = arith.addf %303, %304 : vector<16x64xf32>
    %306 = arith.mulf %295, %265 : vector<16x64xf32>
    %307 = arith.mulf %287, %297 : vector<16x64xf32>
    %308 = arith.addf %306, %307 : vector<16x64xf32>
    %309 = math.tanh %308 : vector<16x64xf32>
    %310 = arith.mulf %305, %309 : vector<16x64xf32>
    %311 = arith.truncf %310 : vector<16x64xf32> to vector<16x64xbf16>
    %312 = arith.addi %6, %274 : i32
    %313 = tpu.assume_multiple %312, 16 : i32
    %314 = arith.index_cast %313 : i32 to index
    %c0_101 = arith.constant 0 : index
    %315 = vector.load %arg12[%314, %c0_101] : memref<128x64xbf16, #tpu.memory_space<vmem>>, vector<16x64xbf16>
    tpu.vector_store %arg12[%314, %c0_101], %311 {strides = array<i32>} : memref<128x64xbf16, #tpu.memory_space<vmem>>, vector<16x64xbf16>,
    %c7_i32 = arith.constant 7 : i32
    %c16_i32_102 = arith.constant 16 : i32
    %316 = arith.muli %c7_i32, %c16_i32_102 : i32
    %317 = tpu.assume_multiple %316, 16 : i32
    %318 = arith.index_cast %317 : i32 to index
    %c0_103 = arith.constant 0 : index
    %319 = vector.load %arg11[%318, %c0_103] : memref<128x256xbf16, #tpu.memory_space<vmem>>, vector<16x256xbf16>
    %320 = arith.extf %319 : vector<16x256xbf16> to vector<16x256xf32>
    %cst_104 = arith.constant dense<0.000000e+00> : vector<16x256xf32>
    %321 = tpu.matmul %311, %1, %cst_104 {dimension_numbers = #tpu.dot_dimension_numbers<[1], [0], [0], [1], [0, 0, 1, 1], [], []>} : vector<16x64xbf16>, vector<64x256xbf16>, vector<16x256xf32> -> vector<16x256xf32>
    %322 = arith.addf %320, %321 : vector<16x256xf32>
    %323 = vector.extract_strided_slice %322 {offsets = [0, 0], sizes = [16, 64], strides = [1, 1]} : vector<16x256xf32> to vector<16x64xf32>
    %cst_105 = arith.constant 5.000000e-01 : f32
    %324 = vector.broadcast %cst_105 : f32 to vector<16x64xf32>
    %325 = arith.mulf %324, %323 : vector<16x64xf32>
    %326 = math.tanh %325 : vector<16x64xf32>
    %cst_106 = arith.constant 5.000000e-01 : f32
    %327 = vector.broadcast %cst_106 : f32 to vector<16x64xf32>
    %328 = arith.mulf %327, %326 : vector<16x64xf32>
    %cst_107 = arith.constant 5.000000e-01 : f32
    %329 = vector.broadcast %cst_107 : f32 to vector<16x64xf32>
    %330 = arith.addf %328, %329 : vector<16x64xf32>
    %331 = vector.extract_strided_slice %322 {offsets = [0, 64], sizes = [16, 64], strides = [1, 1]} : vector<16x256xf32> to vector<16x64xf32>
    %cst_108 = arith.constant 5.000000e-01 : f32
    %332 = vector.broadcast %cst_108 : f32 to vector<16x64xf32>
    %333 = arith.mulf %332, %331 : vector<16x64xf32>
    %334 = math.tanh %333 : vector<16x64xf32>
    %cst_109 = arith.constant 5.000000e-01 : f32
    %335 = vector.broadcast %cst_109 : f32 to vector<16x64xf32>
    %336 = arith.mulf %335, %334 : vector<16x64xf32>
    %cst_110 = arith.constant 5.000000e-01 : f32
    %337 = vector.broadcast %cst_110 : f32 to vector<16x64xf32>
    %338 = arith.addf %336, %337 : vector<16x64xf32>
    %339 = vector.extract_strided_slice %322 {offsets = [0, 128], sizes = [16, 64], strides = [1, 1]} : vector<16x256xf32> to vector<16x64xf32>
    %340 = math.tanh %339 : vector<16x64xf32>
    %341 = vector.extract_strided_slice %322 {offsets = [0, 192], sizes = [16, 64], strides = [1, 1]} : vector<16x256xf32> to vector<16x64xf32>
    %cst_111 = arith.constant 5.000000e-01 : f32
    %342 = vector.broadcast %cst_111 : f32 to vector<16x64xf32>
    %343 = arith.mulf %342, %341 : vector<16x64xf32>
    %344 = math.tanh %343 : vector<16x64xf32>
    %cst_112 = arith.constant 5.000000e-01 : f32
    %345 = vector.broadcast %cst_112 : f32 to vector<16x64xf32>
    %346 = arith.mulf %345, %344 : vector<16x64xf32>
    %cst_113 = arith.constant 5.000000e-01 : f32
    %347 = vector.broadcast %cst_113 : f32 to vector<16x64xf32>
    %348 = arith.addf %346, %347 : vector<16x64xf32>
    %349 = arith.mulf %338, %308 : vector<16x64xf32>
    %350 = arith.mulf %330, %340 : vector<16x64xf32>
    %351 = arith.addf %349, %350 : vector<16x64xf32>
    %352 = math.tanh %351 : vector<16x64xf32>
    %353 = arith.mulf %348, %352 : vector<16x64xf32>
    %354 = arith.truncf %353 : vector<16x64xf32> to vector<16x64xbf16>
    %355 = arith.addi %6, %317 : i32
    %356 = tpu.assume_multiple %355, 16 : i32
    %357 = arith.index_cast %356 : i32 to index
    %c0_114 = arith.constant 0 : index
    %358 = vector.load %arg12[%357, %c0_114] : memref<128x64xbf16, #tpu.memory_space<vmem>>, vector<16x64xbf16>
    tpu.vector_store %arg12[%357, %c0_114], %354 {strides = array<i32>} : memref<128x64xbf16, #tpu.memory_space<vmem>>, vector<16x64xbf16>,
    %c8_i32 = arith.constant 8 : i32
    %c1_i32_115 = arith.constant 1 : i32
    %c0_116 = arith.constant 0 : index
    %c0_117 = arith.constant 0 : index
    %359 = vector.load %arg12[%c0_116, %c0_117] : memref<128x64xbf16, #tpu.memory_space<vmem>>, vector<128x64xbf16>
    %c0_118 = arith.constant 0 : index
    %c0_119 = arith.constant 0 : index
    %360 = vector.load %arg5[%c0_118, %c0_119] : memref<64x32xbf16, #tpu.memory_space<vmem>>, vector<64x32xbf16>
    %cst_120 = arith.constant dense<0.000000e+00> : vector<128x32xf32>
    %361 = tpu.matmul %359, %360, %cst_120 {dimension_numbers = #tpu.dot_dimension_numbers<[1], [0], [0], [1], [0, 0, 1, 1], [], []>} : vector<128x64xbf16>, vector<64x32xbf16>, vector<128x32xf32> -> vector<128x32xf32>
    %c0_121 = arith.constant 0 : index
    %c0_122 = arith.constant 0 : index
    %362 = vector.load %arg6[%c0_121, %c0_122] : memref<1x32xf32, #tpu.memory_space<vmem>>, vector<1x32xf32>
    %363 = vector.broadcast %362 : vector<1x32xf32> to vector<128x32xf32>
    %364 = arith.addf %361, %363 : vector<128x32xf32>
    %365 = vector.extract_strided_slice %364 {offsets = [0, 0], sizes = [128, 16], strides = [1, 1]} : vector<128x32xf32> to vector<128x16xf32>
    %366 = vector.extract_strided_slice %364 {offsets = [0, 16], sizes = [128, 16], strides = [1, 1]} : vector<128x32xf32> to vector<128x16xf32>
    %367 = arith.mulf %365, %366 : vector<128x16xf32>
    %368 = arith.truncf %367 : vector<128x16xf32> to vector<128x16xbf16>
    %c0_123 = arith.constant 0 : index
    %c0_124 = arith.constant 0 : index
    %369 = vector.load %arg7[%c0_123, %c0_124] : memref<16x16xbf16, #tpu.memory_space<vmem>>, vector<16x16xbf16>
    %cst_125 = arith.constant dense<0.000000e+00> : vector<128x16xf32>
    %370 = tpu.matmul %368, %369, %cst_125 {dimension_numbers = #tpu.dot_dimension_numbers<[1], [0], [0], [1], [0, 0, 1, 1], [], []>} : vector<128x16xbf16>, vector<16x16xbf16>, vector<128x16xf32> -> vector<128x16xf32>
    %c0_126 = arith.constant 0 : index
    %c0_127 = arith.constant 0 : index
    %c0_128 = arith.constant 0 : index
    %371 = vector.load %arg1[%c0_126, %c0_127, %c0_128] : memref<1x128x16xbf16, #tpu.memory_space<vmem>>, vector<1x128x16xbf16>
    %372 = vector.shape_cast %371 : vector<1x128x16xbf16> to vector<128x16xbf16>
    %c0_129 = arith.constant 0 : index
    %c0_130 = arith.constant 0 : index
    %373 = vector.load %arg8[%c0_129, %c0_130] : memref<16x16xbf16, #tpu.memory_space<vmem>>, vector<16x16xbf16>
    %cst_131 = arith.constant dense<0.000000e+00> : vector<128x16xf32>
    %374 = tpu.matmul %372, %373, %cst_131 {dimension_numbers = #tpu.dot_dimension_numbers<[1], [0], [0], [1], [0, 0, 1, 1], [], []>} : vector<128x16xbf16>, vector<16x16xbf16>, vector<128x16xf32> -> vector<128x16xf32>
    %375 = arith.addf %370, %374 : vector<128x16xf32>
    %c0_132 = arith.constant 0 : index
    %c0_133 = arith.constant 0 : index
    %376 = vector.load %arg9[%c0_132, %c0_133] : memref<1x16xf32, #tpu.memory_space<vmem>>, vector<1x16xf32>
    %377 = vector.broadcast %376 : vector<1x16xf32> to vector<128x16xf32>
    %378 = arith.addf %375, %377 : vector<128x16xf32>
    %c0_134 = arith.constant 0 : index
    %c0_135 = arith.constant 0 : index
    %c0_136 = arith.constant 0 : index
    %379 = vector.load %arg10[%c0_134, %c0_135, %c0_136] : memref<1x128x16xf32, #tpu.memory_space<vmem>>, vector<1x128x16xf32>
    %380 = vector.shape_cast %379 : vector<1x128x16xf32> to vector<128x16xf32>
    %381 = vector.shape_cast %378 : vector<128x16xf32> to vector<1x128x16xf32>
    tpu.vector_store %arg10[%c0_134, %c0_135, %c0_136], %381 {strides = array<i32>} : memref<1x128x16xf32, #tpu.memory_space<vmem>>, vector<1x128x16xf32>,
    return
  }
  func.func @transform_0(%arg0: i32) -> (i32, i32, i32) {
    %c0_i32 = arith.constant 0 : i32
    %c0_i32_0 = arith.constant 0 : i32
    %c0_i32_1 = arith.constant 0 : i32
    return %arg0, %c0_i32, %c0_i32_0 : i32, i32, i32
  }
  func.func @transform_1(%arg0: i32) -> (i32, i32) {
    %c0_i32 = arith.constant 0 : i32
    %c0_i32_0 = arith.constant 0 : i32
    %c0_i32_1 = arith.constant 0 : i32
    return %c0_i32, %c0_i32_0 : i32, i32
  }
  func.func @transform_2(%arg0: i32) -> (i32, i32) {
    %c0_i32 = arith.constant 0 : i32
    %c0_i32_0 = arith.constant 0 : i32
    %c0_i32_1 = arith.constant 0 : i32
    return %c0_i32, %c0_i32_0 : i32, i32
  }
  func.func @transform_3(%arg0: i32) -> (i32, i32) {
    %c0_i32 = arith.constant 0 : i32
    %c0_i32_0 = arith.constant 0 : i32
    %c0_i32_1 = arith.constant 0 : i32
    return %c0_i32, %c0_i32_0 : i32, i32
  }
  func.func @transform_4(%arg0: i32) -> (i32, i32) {
    %c0_i32 = arith.constant 0 : i32
    %c0_i32_0 = arith.constant 0 : i32
    %c0_i32_1 = arith.constant 0 : i32
    return %c0_i32, %c0_i32_0 : i32, i32
  }
  func.func @transform_5(%arg0: i32) -> (i32, i32) {
    %c0_i32 = arith.constant 0 : i32
    %c0_i32_0 = arith.constant 0 : i32
    %c0_i32_1 = arith.constant 0 : i32
    return %c0_i32, %c0_i32_0 : i32, i32
  }
  func.func @transform_6(%arg0: i32) -> (i32, i32) {
    %c0_i32 = arith.constant 0 : i32
    %c0_i32_0 = arith.constant 0 : i32
    %c0_i32_1 = arith.constant 0 : i32
    return %c0_i32, %c0_i32_0 : i32, i32
  }
  func.func @transform_7(%arg0: i32) -> (i32, i32) {
    %c0_i32 = arith.constant 0 : i32
    %c0_i32_0 = arith.constant 0 : i32
    %c0_i32_1 = arith.constant 0 : i32
    return %c0_i32, %c0_i32_0 : i32, i32
  }
  func.func @transform_8(%arg0: i32) -> (i32, i32) {
    %c0_i32 = arith.constant 0 : i32
    %c0_i32_0 = arith.constant 0 : i32
    %c0_i32_1 = arith.constant 0 : i32
    return %c0_i32, %c0_i32_0 : i32, i32
  }
  func.func @transform_9(%arg0: i32) -> (i32, i32, i32) {
    %c0_i32 = arith.constant 0 : i32
    %c0_i32_0 = arith.constant 0 : i32
    %c0_i32_1 = arith.constant 0 : i32
    return %arg0, %c0_i32, %c0_i32_0 : i32, i32, i32
  }
}

</mosaic_0001>

<bundles_post_ra>
// kernel: tpu_custom_call.1
= control target key start
LH: loop header
LB: loop body
LE: loop exit
PB: predicated region body
PF: predicated region fallthrough
CT: control target
= control target key end

     0   :  { %v2436_v1 = vmov 0   ;;  %vm121_vm0 = vcmask 130048   ;;  %v61_v14 = vlaneseq  ;;  %vm420_vm1 = vcmask 523264   ;;  %s3085_s1 = inlined_call_operand.vmem [shape: bf16[16,256], index: 1, kind: input, shape index: {}]   ;;  %s3086_s0 = inlined_call_operand.vmem [shape: bf16[1,128,16], index: 0, kind: input, shape index: {}]   ;;  %s3087_s3 = inlined_call_operand.vmem [shape: bf16[64,256], index: 3, kind: input, shape index: {}]   ;;  %s3088_s2 = inlined_call_operand.vmem [shape: f32[1,256], index: 2, kind: input, shape index: {}]   ;;  %s3089_s4 = inlined_call_operand.vmem [shape: bf16[64,32], index: 4, kind: input, shape index: {}]   ;;  %s3090_s7 = inlined_call_operand.vmem [shape: bf16[16,16], index: 7, kind: input, shape index: {}]   ;;  %s3091_s6 = inlined_call_operand.vmem [shape: bf16[16,16], index: 6, kind: input, shape index: {}]   ;;  %s3092_s5 = inlined_call_operand.vmem [shape: f32[1,32], index: 5, kind: input, shape index: {}]   ;;  %s3093_s8 = inlined_call_operand.vmem [shape: f32[1,16], index: 8, kind: input, shape index: {}]   ;;  %s3094_s9 = inlined_call_operand.vmem [shape: f32[1,128,16], index: 9, kind: output, shape index: {}]  }
   0x1   :  { %v2263_v0 = vld [vmem:[%s3085_s1 + $0x4] ss:$8 sps:$4 sm:$0xff]   ;;  %238 = vmatprep.mubr.bf16.mxu1 %v2436_v1  ;;  %178 = vmatprep.mubr.bf16.mxu0 %v2436_v1  ;;  %v2265_v2 = vld [vmem:[%s3085_s1] ss:$8 sps:$4 sm:$0xff]   ;;  %v2266_v3 = vld [vmem:[%s3086_s0 + $0x30] sm:$0xff]   ;;  %vm524_vm2 = vcmask 519168  }
   0x2   :  { %2258 = vmatprep.subr.bf16.mxu1 %v2263_v0  ;;  %160 = vmatprep.subr.bf16.mxu0 %v2263_v0  ;;  %v2503_v4 = vld [vmem:[%s3087_s3 + $0x34] ss:$8 sps:$4 sm:$0xff]   ;;  %v2508_v5 = vld [vmem:[%s3087_s3 + $0x30] ss:$8 sps:$4 sm:$0xff]   ;;  %v2270_v6 = vld [vmem:[%s3086_s0] sm:$0xff]   ;;  %v62_v15 = vshrl.u32 %v61_v14, 7 }
   0x3   :  { %2259 = vmatpush1.bf16.msra.mxu1 %v2265_v2  ;;  %161 = vmatpush1.bf16.msra.mxu0 %v2265_v2  ;;  %v2517_v7 = vld [vmem:[%s3087_s3 + $0x24] ss:$8 sps:$4 sm:$0xff]   ;;  %v2526_v8 = vld [vmem:[%s3087_s3 + $0x20] ss:$8 sps:$4 sm:$0xff]   ;;  %v2533_v9 = vld [vmem:[%s3087_s3 + $0x14] ss:$8 sps:$4 sm:$0xff]  }
   0x4   :  { %432 = vmatprep.subr.bf16.mxu1 %v2503_v4  ;;  %897 = vmatprep.subr.bf16.mxu0 %v2503_v4  ;;  %v2274_v10 = vld [vmem:[%s3086_s0 + $0x38] sm:$0xff]   ;;  %v2548_v12 = vld [vmem:[%s3087_s3 + $0x4] ss:$8 sps:$4 sm:$0xff]   ;;  %v2556_v13 = vld [vmem:[%s3087_s3] ss:$8 sps:$4 sm:$0xff]   ;;  %v63_v16 = vsub.s32 0, %v62_v15 }
   0x5   :  { %v2542_v11 = vld [vmem:[%s3087_s3 + $0x10] ss:$8 sps:$4 sm:$0xff]   ;;  %v67_v17 = vsub.s32 1, %v62_v15  ;;  %v43_v18 = vld [vmem:[%s3088_s2] sm:$0x3]  ;;  %s2437_s2 = smov 64  }
   0x6   :  { %2039 = vmatmul.mubr.msk.bf16.vlgmr.msra.gmra.mxu1 %vm121_vm0, %v2266_v3  ;;  %2033 = vmatmul.mubr.msk.bf16.vlgmr.msra.gmra.mxu0 %vm121_vm0, %v2270_v6  ;;  %v2583_v19 = vrot.slane %v43_v18, %v63_v16 }
   0x7   :  { %433 = vmatpush1.bf16.msra.mxu1 %v2508_v5  ;;  %248 = vmatprep.mubr.bf16.mxu1 %v2436_v1  ;;  %v2585_v20 = vrot.slane %v43_v18, %v67_v17 }
   0x8   :  { %434 = vmatprep.subr.bf16.mxu1 %v2517_v7  ;;  %188 = vmatprep.mubr.bf16.mxu0 %v2436_v1 }
   0x9   :  { %898 = vmatpush1.bf16.msra.mxu0 %v2508_v5 }
   0xa   :  { %899 = vmatprep.subr.bf16.mxu0 %v2517_v7 }
   0xb   :  { %435 = vmatpush1.bf16.msra.mxu1 %v2526_v8 }
   0xc   :  { %436 = vmatprep.subr.bf16.mxu1 %v2533_v9 }
   0xd   :  { %900 = vmatpush1.bf16.msra.mxu0 %v2526_v8 }
   0xe   :  { %2040 = vmatmul.mubr.msk.bf16.gmra.mxu1 %vm121_vm0, %v2274_v10  ;;  %901 = vmatprep.subr.bf16.mxu0 %v2533_v9 }
   0xf   :  { %437 = vmatpush1.bf16.msra.mxu1 %v2542_v11  ;;  %456 = vmatprep.mubr.bf16.mxu1 %v2436_v1 }
  0x10   :  { %438 = vmatprep.subr.bf16.mxu1 %v2548_v12 }
  0x11   :  { %902 = vmatpush1.bf16.msra.mxu0 %v2542_v11 }
  0x12   :  { %903 = vmatprep.subr.bf16.mxu0 %v2548_v12 }
  0x13   :  { %439 = vmatpush1.bf16.msra.mxu1 %v2556_v13 }
  0x14   :  { %549 = vmatprep.subr.bf16.mxu1 %v2503_v4 }
  0x15   :  { %904 = vmatpush1.bf16.msra.mxu0 %v2556_v13 }
  0x16   :  { %457 = vmatmul.mubr.bf16.vlgmr.msra.gmra.mxu1 %v2436_v1  ;;  %1129 = vmatprep.subr.bf16.mxu0 %v2503_v4 }
  0x17   :  { %550 = vmatpush1.bf16.msra.mxu1 %v2508_v5  ;;  %573 = vmatprep.mubr.bf16.mxu1 %v2436_v1 }
  0x18   :  { %551 = vmatprep.subr.bf16.mxu1 %v2517_v7 }
  0x1b   :  { %552 = vmatpush1.bf16.msra.mxu1 %v2526_v8 }
  0x1c   :  { %553 = vmatprep.subr.bf16.mxu1 %v2533_v9 }
  0x1f   :  { %554 = vmatpush1.bf16.msra.mxu1 %v2542_v11 }
  0x20   :  { %555 = vmatprep.subr.bf16.mxu1 %v2548_v12 }
  0x23   :  { %556 = vmatpush1.bf16.msra.mxu1 %v2556_v13 }
  0x24   :  { %665 = vmatprep.subr.bf16.mxu1 %v2503_v4 }
  0xc6   :  { %v240_v21 = vpop.f32.mrf.mxu1  ;;  %v180_v22 = vpop.f32.mrf.mxu0 }
  0xc7   :  { %v241_v25 = vadd.f32 %v240_v21, %v2583_v19  ;;  %v181_v30 = vadd.f32 %v180_v22, %v2583_v19  ;;  %v2281_v22 = vld [vmem:[%s3086_s0 + $0x8] sm:$0xff]  }
  0xc8   :  { %v242_v23 = vpop.f32.mrf.mxu1  ;;  %v182_v24 = vpop.f32.mrf.mxu0  ;;  %2034 = vmatmul.mubr.msk.bf16.gmra.mxu0 %vm121_vm0, %v2281_v22 }
  0xc9   :  { %v243_v26 = vadd.f32 %v242_v23, %v2585_v20  ;;  %v183_v31 = vadd.f32 %v182_v24, %v2585_v20  ;;  %198 = vmatprep.mubr.bf16.mxu0 %v2436_v1 }
  0xca   :  { %v244_v27 = vpop.f32.mrf.mxu1  ;;  %v184_v28 = vpop.f32.mrf.mxu0 }
  0xcb   :  { %v2589_v29 = vpack.c.bf16 %v243_v26, %v241_v25  ;;  %v245_v33 = vadd.f32 %v244_v27, %v2583_v19  ;;  %v2136_v38 = vpack.c.bf16 %v183_v31, %v181_v30  ;;  %v185_v40 = vadd.f32 %v184_v28, %v2583_v19 }
  0xcc   :  { %v246_v32 = vpop.f32.mrf.mxu1  ;;  %v186_v36 = vpop.f32.mrf.mxu0 }
  0xcd   :  { %v247_v34 = vadd.f32 %v246_v32, %v2585_v20  ;;  %v187_v42 = vadd.f32 %v186_v36, %v2585_v20  ;;  %v376_v50 = vunpack.c.l.bf16 %v2136_v38  ;;  %v377_v54 = vunpack.c.h.bf16 %v2136_v38 }
  0xce   :  { %v250_v35 = vpop.f32.mrf.mxu1 }
  0xcf   :  { %v2595_v37 = vpack.c.bf16 %v247_v34, %v245_v33  ;;  %v251_v41 = vadd.f32 %v250_v35, %v2583_v19  ;;  %v2137_v47 = vpack.c.bf16 %v187_v42, %v185_v40 }
  0xd0   :  { %v252_v39 = vpop.f32.mrf.mxu1 }
  0xd1   :  { %v253_v43 = vadd.f32 %v252_v39, %v2585_v20  ;;  %v378_v57 = vunpack.c.l.bf16 %v2137_v47  ;;  %v379_v63 = vunpack.c.h.bf16 %v2137_v47 }
  0xd2   :  { %v254_v44 = vpop.f32.mrf.mxu1 }
  0xd3   :  { %v2601_v45 = vpack.c.bf16 %v253_v43, %v251_v41  ;;  %v255_v48 = vadd.f32 %v254_v44, %v2583_v19 }
  0xd4   :  { %v256_v46 = vpop.f32.mrf.mxu1 }
  0xd5   :  { %v257_v49 = vadd.f32 %v256_v46, %v2585_v20 }
  0xd6   :  { %v458_v51 = vpop.f32.mrf.mxu1 }
  0xd7   :  { %v2605_v52 = vpack.c.bf16 %v257_v49, %v255_v48  ;;  %v467_v53 = vadd.f32 %v458_v51, %v376_v50 }
  0xd8   :  { %v460_v55 = vpop.f32.mrf.mxu1 }
  0xd9   :  { %v471_v56 = vmul.f32 0.5, %v467_v53  ;;  %v468_v58 = vadd.f32 %v460_v55, %v377_v54 }
  0xda   :  { %v462_v59 = vpop.f32.mrf.mxu1 }
  0xdb   :  { %2308 = vtanh.f32 %v471_v56  ;;  %v469_v60 = vadd.f32 %v462_v59, %v378_v57  ;;  %v481_v23 = vmul.f32 0.5, %v468_v58 }
  0xdc   :  { %v464_v61 = vpop.f32.mrf.mxu1  ;;  %2310 = vtanh.f32 %v468_v58 }
  0xdd   :  { %v472_v62 = vmul.f32 0.5, %v469_v60  ;;  %v470_v0 = vadd.f32 %v464_v61, %v379_v63 }
  0xdf   :  { %2312 = vtanh.f32 %v472_v62  ;;  %v482_v24 = vmul.f32 0.5, %v470_v0 }
  0xe0   :  { %2314 = vtanh.f32 %v470_v0 }
  0xe1   :  { %2316 = vtanh.f32 %v481_v23 }
  0xe2   :  { %2318 = vtanh.f32 %v482_v24 }
  0xe8   :  { %v2309_v2 = vpop.eup %2308 }
  0xe9   :  { %v475_v3 = vmul.f32 0.5, %v2309_v2  ;;  %v2311_v6 = vpop.eup %2310 }
  0xeb   :  { %v477_v10 = vadd.f32 0.5, %v475_v3 }
  0xec   :  { %v2313_v14 = vpop.eup %2312 }
  0xed   :  { %v476_v15 = vmul.f32 0.5, %v2313_v14  ;;  %v491_v16 = vmul.f32 %v2311_v6, %v477_v10  ;;  %v2315_v18 = vpop.eup %2314  ;;  %v489_v25 = vmul.f32 0.0, %v477_v10 }
  0xee   :  { %v2317_v32 = vpop.eup %2316 }
  0xef   :  { %v478_v17 = vadd.f32 0.5, %v476_v15  ;;  %495 = vrot.lane.b32.xlu0 %v491_v16, %s2437_s2  ;;  %v2319_v33 = vpop.eup %2318  ;;  %v485_v34 = vmul.f32 0.5, %v2317_v32 }
  0xf0   :  { %v486_v35 = vmul.f32 0.5, %v2319_v33 }
  0xf1   :  { %v492_v21 = vmul.f32 %v2315_v18, %v478_v17  ;;  %v490_v28 = vmul.f32 0.0, %v478_v17  ;;  %v487_v38 = vadd.f32 0.5, %v485_v34 }
  0xf2   :  { %v488_v39 = vadd.f32 0.5, %v486_v35 }
  0xf3   :  { %497 = vrot.lane.b32.xlu0 %v492_v21, %s2437_s2 }
 0x161   :  { %v496_v26 = vpop.permute.xlu0 %495 }
 0x162   :  { %v2614_v27 = vadd.f32 %v496_v26, %v489_v25 }
 0x164   :  { %2320 = vtanh.f32 %v2614_v27 }
 0x165   :  { %v498_v30 = vpop.permute.xlu0 %497 }
 0x166   :  { %v2617_v31 = vadd.f32 %v498_v30, %v490_v28  ;;  %v2282_v30 = vld [vmem:[%s3086_s0 + $0x10] sm:$0xff]  }
 0x167   :  { %2035 = vmatmul.mubr.msk.bf16.gmra.mxu0 %vm121_vm0, %v2282_v30 }
 0x168   :  { %2322 = vtanh.f32 %v2617_v31  ;;  %208 = vmatprep.mubr.bf16.mxu0 %v2436_v1 }
 0x171   :  { %v2321_v36 = vpop.eup %2320 }
 0x172   :  { %v2620_v41 = vmul.f32 %v2321_v36, %v487_v38 }
 0x175   :  { %v2323_v40 = vpop.eup %2322 }
 0x176   :  { %v2622_v42 = vmul.f32 %v2323_v40, %v488_v39 }
 0x178   :  { %v507_v43 = vpack.c.bf16 %v2622_v42, %v2620_v41 }
 0x17a   :  { %536 = vrot.lane.b32.xlu1 %v507_v43, %s2437_s2 }
 0x188   :  { %v190_v46 = vpop.f32.mrf.mxu0 }
 0x189   :  { %v191_v49 = vadd.f32 %v190_v46, %v2583_v19 }
 0x18a   :  { %v192_v47 = vpop.f32.mrf.mxu0 }
 0x18b   :  { %v193_v50 = vadd.f32 %v192_v47, %v2585_v20 }
 0x18c   :  { %v194_v48 = vpop.f32.mrf.mxu0 }
 0x18d   :  { %v2138_v53 = vpack.c.bf16 %v193_v50, %v191_v49  ;;  %v195_v54 = vadd.f32 %v194_v48, %v2583_v19 }
 0x18e   :  { %v196_v51 = vpop.f32.mrf.mxu0 }
 0x18f   :  { %v197_v55 = vadd.f32 %v196_v51, %v2585_v20  ;;  %v532_v57 = vunpack.c.l.bf16 %v2138_v53  ;;  %v533_v60 = vunpack.c.h.bf16 %v2138_v53 }
 0x191   :  { %v2139_v56 = vpack.c.bf16 %v197_v55, %v195_v54 }
 0x193   :  { %v534_v63 = vunpack.c.l.bf16 %v2139_v56  ;;  %v535_v14 = vunpack.c.h.bf16 %v2139_v56 }
 0x1ec   :  { %v537_v44 = vpop.permute.xlu1 %536 }
 0x1ed   :  { %2067 = vmatmul.mubr.msk.bf16.vlgmr.msra.gmra.mxu1 %vm420_vm1, %v537_v44 }
 0x1ee   :  { %666 = vmatpush1.bf16.msra.mxu1 %v2508_v5  ;;  %689 = vmatprep.mubr.bf16.mxu1 %v2436_v1 }
 0x1ef   :  { %667 = vmatprep.subr.bf16.mxu1 %v2517_v7 }
 0x1f2   :  { %668 = vmatpush1.bf16.msra.mxu1 %v2526_v8 }
 0x1f3   :  { %669 = vmatprep.subr.bf16.mxu1 %v2533_v9 }
 0x1f6   :  { %670 = vmatpush1.bf16.msra.mxu1 %v2542_v11 }
 0x1f7   :  { %671 = vmatprep.subr.bf16.mxu1 %v2548_v12 }
 0x1fa   :  { %672 = vmatpush1.bf16.msra.mxu1 %v2556_v13 }
 0x1fb   :  { %781 = vmatprep.subr.bf16.mxu1 %v2503_v4 }
 0x227   :  { %v200_v55 = vpop.f32.mrf.mxu0 }
 0x229   :  { %v202_v56 = vpop.f32.mrf.mxu0 }
 0x2ad   :  { %v575_v58 = vpop.f32.mrf.mxu1 }
 0x2ae   :  { %v584_v59 = vadd.f32 %v575_v58, %v532_v57  ;;  %v204_v57 = vpop.f32.mrf.mxu0  ;;  %v201_v58 = vadd.f32 %v200_v55, %v2583_v19 }
 0x2af   :  { %v577_v61 = vpop.f32.mrf.mxu1 }
 0x2b0   :  { %v588_v62 = vmul.f32 0.5, %v584_v59  ;;  %v585_v0 = vadd.f32 %v577_v61, %v533_v60  ;;  %v203_v59 = vadd.f32 %v202_v56, %v2585_v20  ;;  %v206_v60 = vpop.f32.mrf.mxu0 }
 0x2b1   :  { %v579_v2 = vpop.f32.mrf.mxu1 }
 0x2b2   :  { %2324 = vtanh.f32 %v588_v62  ;;  %v586_v3 = vadd.f32 %v579_v2, %v534_v63  ;;  %v598_v32 = vmul.f32 0.5, %v585_v0  ;;  %v2140_v61 = vpack.c.bf16 %v203_v59, %v201_v58 }
 0x2b3   :  { %v581_v6 = vpop.f32.mrf.mxu1  ;;  %2326 = vtanh.f32 %v585_v0  ;;  %v205_v62 = vadd.f32 %v204_v57, %v2583_v19  ;;  %v207_v63 = vadd.f32 %v206_v60, %v2585_v20 }
 0x2b4   :  { %v589_v10 = vmul.f32 0.5, %v586_v3  ;;  %v587_v15 = vadd.f32 %v581_v6, %v535_v14  ;;  %v648_v2 = vunpack.c.l.bf16 %v2140_v61 }
 0x2b5   :  { %v2141_v0 = vpack.c.bf16 %v207_v63, %v205_v62 }
 0x2b6   :  { %2328 = vtanh.f32 %v589_v10  ;;  %v599_v33 = vmul.f32 0.5, %v587_v15  ;;  %v649_v10 = vunpack.c.h.bf16 %v2140_v61 }
 0x2b7   :  { %2330 = vtanh.f32 %v587_v15 }
 0x2b8   :  { %2332 = vtanh.f32 %v598_v32 }
 0x2b9   :  { %2334 = vtanh.f32 %v599_v33 }
 0x2bf   :  { %v2325_v16 = vpop.eup %2324 }
 0x2c0   :  { %v592_v17 = vmul.f32 0.5, %v2325_v16  ;;  %v2327_v18 = vpop.eup %2326  ;;  %v650_v16 = vunpack.c.l.bf16 %v2141_v0 }
 0x2c2   :  { %v594_v21 = vadd.f32 0.5, %v592_v17 }
 0x2c3   :  { %v2329_v22 = vpop.eup %2328 }
 0x2c4   :  { %v593_v23 = vmul.f32 0.5, %v2329_v22  ;;  %v608_v24 = vmul.f32 %v2327_v18, %v594_v21  ;;  %v2331_v26 = vpop.eup %2330  ;;  %v606_v34 = vmul.f32 %v594_v21, %v2614_v27 }
 0x2c5   :  { %v2333_v43 = vpop.eup %2332 }
 0x2c6   :  { %v595_v25 = vadd.f32 0.5, %v593_v23  ;;  %612 = vrot.lane.b32.xlu1 %v608_v24, %s2437_s2  ;;  %v2335_v44 = vpop.eup %2334  ;;  %v602_v46 = vmul.f32 0.5, %v2333_v43  ;;  %v651_v24 = vunpack.c.h.bf16 %v2141_v0 }
 0x2c7   :  { %v603_v47 = vmul.f32 0.5, %v2335_v44  ;;  %v2283_v44 = vld [vmem:[%s3086_s0 + $0x18] sm:$0xff]  }
 0x2c8   :  { %v609_v28 = vmul.f32 %v2331_v26, %v595_v25  ;;  %v607_v38 = vmul.f32 %v595_v25, %v2617_v31  ;;  %v604_v49 = vadd.f32 0.5, %v602_v46  ;;  %2036 = vmatmul.mubr.msk.bf16.gmra.mxu0 %vm121_vm0, %v2283_v44 }
 0x2c9   :  { %v605_v50 = vadd.f32 0.5, %v603_v47  ;;  %218 = vmatprep.mubr.bf16.mxu0 %v2436_v1 }
 0x2ca   :  { %614 = vrot.lane.b32.xlu0 %v609_v28, %s2437_s2 }
 0x338   :  { %v613_v35 = vpop.permute.xlu1 %612 }
 0x339   :  { %v2649_v36 = vadd.f32 %v613_v35, %v606_v34 }
 0x33b   :  { %2336 = vtanh.f32 %v2649_v36 }
 0x33c   :  { %v615_v39 = vpop.permute.xlu0 %614 }
 0x33d   :  { %v2653_v40 = vadd.f32 %v615_v39, %v607_v38 }
 0x33f   :  { %2338 = vtanh.f32 %v2653_v40 }
 0x348   :  { %v2337_v48 = vpop.eup %2336 }
 0x349   :  { %v2656_v51 = vmul.f32 %v2337_v48, %v604_v49 }
 0x34c   :  { %v2339_v27 = vpop.eup %2338 }
 0x34d   :  { %v2658_v53 = vmul.f32 %v2339_v27, %v605_v50 }
 0x34f   :  { %v624_v31 = vpack.c.bf16 %v2658_v53, %v2656_v51 }
 0x351   :  { %652 = vrot.lane.b32.xlu1 %v624_v31, %s2437_s2 }
 0x3c3   :  { %v653_v54 = vpop.permute.xlu1 %652 }
 0x3c4   :  { %2070 = vmatmul.mubr.msk.bf16.vlgmr.msra.gmra.mxu1 %vm420_vm1, %v653_v54 }
 0x3c5   :  { %782 = vmatpush1.bf16.msra.mxu1 %v2508_v5  ;;  %805 = vmatprep.mubr.bf16.mxu1 %v2436_v1 }
 0x3c6   :  { %783 = vmatprep.subr.bf16.mxu1 %v2517_v7 }
 0x3c9   :  { %784 = vmatpush1.bf16.msra.mxu1 %v2526_v8 }
 0x3ca   :  { %785 = vmatprep.subr.bf16.mxu1 %v2533_v9 }
 0x3cd   :  { %786 = vmatpush1.bf16.msra.mxu1 %v2542_v11 }
 0x3ce   :  { %787 = vmatprep.subr.bf16.mxu1 %v2548_v12 }
 0x3d1   :  { %788 = vmatpush1.bf16.msra.mxu1 %v2556_v13 }
 0x3d2   :  { %1013 = vmatprep.subr.bf16.mxu1 %v2503_v4 }
 0x484   :  { %v691_v3 = vpop.f32.mrf.mxu1 }
 0x485   :  { %v700_v6 = vadd.f32 %v691_v3, %v648_v2  ;;  %v210_v2 = vpop.f32.mrf.mxu0 }
 0x486   :  { %v693_v14 = vpop.f32.mrf.mxu1 }
 0x487   :  { %v704_v15 = vmul.f32 0.5, %v700_v6  ;;  %v701_v17 = vadd.f32 %v693_v14, %v649_v10  ;;  %v212_v3 = vpop.f32.mrf.mxu0  ;;  %v211_v10 = vadd.f32 %v210_v2, %v2583_v19 }
 0x488   :  { %v695_v18 = vpop.f32.mrf.mxu1  ;;  %v213_v14 = vadd.f32 %v212_v3, %v2585_v20 }
 0x489   :  { %2340 = vtanh.f32 %v704_v15  ;;  %v702_v21 = vadd.f32 %v695_v18, %v650_v16  ;;  %v714_v46 = vmul.f32 0.5, %v701_v17  ;;  %v214_v6 = vpop.f32.mrf.mxu0 }
 0x48a   :  { %v697_v22 = vpop.f32.mrf.mxu1  ;;  %2342 = vtanh.f32 %v701_v17  ;;  %v2142_v16 = vpack.c.bf16 %v213_v14, %v211_v10  ;;  %v215_v17 = vadd.f32 %v214_v6, %v2583_v19 }
 0x48b   :  { %v705_v23 = vmul.f32 0.5, %v702_v21  ;;  %v703_v25 = vadd.f32 %v697_v22, %v651_v24  ;;  %v216_v15 = vpop.f32.mrf.mxu0 }
 0x48c   :  { %v217_v18 = vadd.f32 %v216_v15, %v2585_v20  ;;  %v764_v22 = vunpack.c.l.bf16 %v2142_v16 }
 0x48d   :  { %2344 = vtanh.f32 %v705_v23  ;;  %v715_v47 = vmul.f32 0.5, %v703_v25 }
 0x48e   :  { %2346 = vtanh.f32 %v703_v25  ;;  %v2143_v21 = vpack.c.bf16 %v217_v18, %v215_v17  ;;  %v765_v25 = vunpack.c.h.bf16 %v2142_v16 }
 0x48f   :  { %2348 = vtanh.f32 %v714_v46 }
 0x490   :  { %2350 = vtanh.f32 %v715_v47 }
 0x496   :  { %v2341_v26 = vpop.eup %2340 }
 0x497   :  { %v708_v28 = vmul.f32 0.5, %v2341_v26  ;;  %v2343_v30 = vpop.eup %2342 }
 0x499   :  { %v710_v32 = vadd.f32 0.5, %v708_v28  ;;  %v766_v28 = vunpack.c.l.bf16 %v2143_v21 }
 0x49a   :  { %v2345_v33 = vpop.eup %2344 }
 0x49b   :  { %v709_v34 = vmul.f32 0.5, %v2345_v33  ;;  %v724_v35 = vmul.f32 %v2343_v30, %v710_v32  ;;  %v2347_v39 = vpop.eup %2346  ;;  %v722_v48 = vmul.f32 %v710_v32, %v2649_v36 }
 0x49c   :  { %v2349_v55 = vpop.eup %2348 }
 0x49d   :  { %v711_v38 = vadd.f32 0.5, %v709_v34  ;;  %728 = vrot.lane.b32.xlu0 %v724_v35, %s2437_s2  ;;  %v2351_v56 = vpop.eup %2350  ;;  %v718_v57 = vmul.f32 0.5, %v2349_v55 }
 0x49e   :  { %v719_v58 = vmul.f32 0.5, %v2351_v56 }
 0x49f   :  { %v725_v43 = vmul.f32 %v2347_v39, %v711_v38  ;;  %v723_v27 = vmul.f32 %v711_v38, %v2653_v40  ;;  %v720_v60 = vadd.f32 0.5, %v718_v57  ;;  %v767_v38 = vunpack.c.h.bf16 %v2143_v21  ;;  %v2284_v57 = vld [vmem:[%s3086_s0 + $0x20] sm:$0xff]  }
 0x4a0   :  { %v721_v61 = vadd.f32 0.5, %v719_v58  ;;  %2037 = vmatmul.mubr.msk.bf16.gmra.mxu0 %vm121_vm0, %v2284_v57  ;;  %v2285_v58 = vld [vmem:[%s3086_s0 + $0x28] sm:$0xff]  }
 0x4a1   :  { %730 = vrot.lane.b32.xlu1 %v725_v43, %s2437_s2  ;;  %228 = vmatprep.mubr.bf16.mxu0 %v2436_v1 }
 0x4a8   :  { %2038 = vmatmul.mubr.msk.bf16.gmra.mxu0 %vm121_vm0, %v2285_v58 }
 0x4a9   :  { %921 = vmatprep.mubr.bf16.mxu0 %v2436_v1 }
 0x50f   :  { %v729_v49 = vpop.permute.xlu0 %728 }
 0x510   :  { %v2685_v50 = vadd.f32 %v729_v49, %v722_v48 }
 0x512   :  { %2352 = vtanh.f32 %v2685_v50 }
 0x513   :  { %v731_v31 = vpop.permute.xlu1 %730 }
 0x514   :  { %v2689_v54 = vadd.f32 %v731_v31, %v723_v27 }
 0x516   :  { %2354 = vtanh.f32 %v2689_v54 }
 0x51f   :  { %v2353_v59 = vpop.eup %2352 }
 0x520   :  { %v2692_v62 = vmul.f32 %v2353_v59, %v720_v60 }
 0x523   :  { %v2355_v36 = vpop.eup %2354 }
 0x524   :  { %v2694_v63 = vmul.f32 %v2355_v36, %v721_v61 }
 0x526   :  { %v740_v40 = vpack.c.bf16 %v2694_v63, %v2692_v62 }
 0x528   :  { %768 = vrot.lane.b32.xlu0 %v740_v40, %s2437_s2 }
 0x59a   :  { %v769_v0 = vpop.permute.xlu0 %768 }
 0x59b   :  { %2073 = vmatmul.mubr.msk.bf16.vlgmr.msra.gmra.mxu1 %vm420_vm1, %v769_v0 }
 0x59c   :  { %1014 = vmatpush1.bf16.msra.mxu1 %v2508_v5  ;;  %1037 = vmatprep.mubr.bf16.mxu1 %v2436_v1 }
 0x59d   :  { %1015 = vmatprep.subr.bf16.mxu1 %v2517_v7 }
 0x5a0   :  { %1016 = vmatpush1.bf16.msra.mxu1 %v2526_v8 }
 0x5a1   :  { %1017 = vmatprep.subr.bf16.mxu1 %v2533_v9 }
 0x5a4   :  { %1018 = vmatpush1.bf16.msra.mxu1 %v2542_v11 }
 0x5a5   :  { %1019 = vmatprep.subr.bf16.mxu1 %v2548_v12 }
 0x5a8   :  { %1020 = vmatpush1.bf16.msra.mxu1 %v2556_v13 }
 0x5a9   :  { %1245 = vmatprep.subr.bf16.mxu1 %v2503_v4 }
 0x65b   :  { %v807_v23 = vpop.f32.mrf.mxu1 }
 0x65c   :  { %v816_v24 = vadd.f32 %v807_v23, %v764_v22  ;;  %v220_v23 = vpop.f32.mrf.mxu0 }
 0x65d   :  { %v809_v26 = vpop.f32.mrf.mxu1 }
 0x65e   :  { %v820_v4 = vmul.f32 0.5, %v816_v24  ;;  %v817_v30 = vadd.f32 %v809_v26, %v765_v25  ;;  %v222_v24 = vpop.f32.mrf.mxu0 }
 0x65f   :  { %v811_v32 = vpop.f32.mrf.mxu1 }
 0x660   :  { %2356 = vtanh.f32 %v820_v4  ;;  %v818_v33 = vadd.f32 %v811_v32, %v766_v28  ;;  %v830_v59 = vmul.f32 0.5, %v817_v30  ;;  %v224_v25 = vpop.f32.mrf.mxu0 }
 0x661   :  { %v813_v34 = vpop.f32.mrf.mxu1  ;;  %2358 = vtanh.f32 %v817_v30 }
 0x662   :  { %v821_v35 = vmul.f32 0.5, %v818_v33  ;;  %v819_v39 = vadd.f32 %v813_v34, %v767_v38  ;;  %v226_v26 = vpop.f32.mrf.mxu0  ;;  %v223_v38 = vadd.f32 %v222_v24, %v2585_v20 }
 0x664   :  { %2360 = vtanh.f32 %v821_v35  ;;  %v831_v60 = vmul.f32 0.5, %v819_v39  ;;  %v230_v4 = vpop.f32.mrf.mxu0  ;;  %v221_v35 = vadd.f32 %v220_v23, %v2583_v19 }
 0x665   :  { %2362 = vtanh.f32 %v819_v39  ;;  %v231_v28 = vadd.f32 %v230_v4, %v2583_v19 }
 0x666   :  { %2364 = vtanh.f32 %v830_v59  ;;  %v232_v30 = vpop.f32.mrf.mxu0 }
 0x667   :  { %2366 = vtanh.f32 %v831_v60  ;;  %v233_v32 = vadd.f32 %v232_v30, %v2585_v20 }
 0x668   :  { %v2755_v39 = vpop.f32.mrf.mxu0 }
 0x669   :  { %v2742_v33 = vpack.c.bf16 %v233_v32, %v231_v28 }
 0x66d   :  { %v2357_v43 = vpop.eup %2356 }
 0x66e   :  { %v824_v44 = vmul.f32 0.5, %v2357_v43  ;;  %v2359_v46 = vpop.eup %2358  ;;  %v2144_v43 = vpack.c.bf16 %v223_v38, %v221_v35 }
 0x670   :  { %v826_v47 = vadd.f32 0.5, %v824_v44  ;;  %v225_v44 = vadd.f32 %v224_v25, %v2583_v19 }
 0x671   :  { %v2361_v48 = vpop.eup %2360 }
 0x672   :  { %v825_v49 = vmul.f32 0.5, %v2361_v48  ;;  %v840_v27 = vmul.f32 %v2359_v46, %v826_v47  ;;  %v2363_v55 = vpop.eup %2362  ;;  %v838_v61 = vmul.f32 %v826_v47, %v2685_v50  ;;  %v227_v46 = vadd.f32 %v226_v26, %v2585_v20  ;;  %v2759_v47 = vpop.f32.mrf.mxu0 }
 0x673   :  { %v2365_v6 = vpop.eup %2364 }
 0x674   :  { %v827_v31 = vadd.f32 0.5, %v825_v49  ;;  %844 = vrot.lane.b32.xlu1 %v840_v27, %s2437_s2  ;;  %v2367_v10 = vpop.eup %2366  ;;  %v834_v14 = vmul.f32 0.5, %v2365_v6  ;;  %v2145_v48 = vpack.c.bf16 %v227_v46, %v225_v44  ;;  %v880_v49 = vunpack.c.l.bf16 %v2144_v43 }
 0x675   :  { %v835_v15 = vmul.f32 0.5, %v2367_v10 }
 0x676   :  { %v841_v56 = vmul.f32 %v2363_v55, %v827_v31  ;;  %v839_v0 = vmul.f32 %v827_v31, %v2689_v54  ;;  %v836_v17 = vadd.f32 0.5, %v834_v14  ;;  %v881_v55 = vunpack.c.h.bf16 %v2144_v43 }
 0x677   :  { %v837_v18 = vadd.f32 0.5, %v835_v15  ;;  %v882_v58 = vunpack.c.l.bf16 %v2145_v48 }
 0x678   :  { %846 = vrot.lane.b32.xlu0 %v841_v56, %s2437_s2 }
 0x6e6   :  { %v845_v36 = vpop.permute.xlu1 %844 }
 0x6e7   :  { %v2726_v40 = vadd.f32 %v845_v36, %v838_v61 }
 0x6e9   :  { %2368 = vtanh.f32 %v2726_v40 }
 0x6ea   :  { %v847_v2 = vpop.permute.xlu0 %846 }
 0x6eb   :  { %v2730_v3 = vadd.f32 %v847_v2, %v839_v0  ;;  %v883_v2 = vunpack.c.h.bf16 %v2145_v48 }
 0x6ed   :  { %2370 = vtanh.f32 %v2730_v3 }
 0x6f6   :  { %v2369_v16 = vpop.eup %2368 }
 0x6f7   :  { %v2733_v21 = vmul.f32 %v2369_v16, %v836_v17 }
 0x6fa   :  { %v2371_v50 = vpop.eup %2370 }
 0x6fb   :  { %v2735_v22 = vmul.f32 %v2371_v50, %v837_v18 }
 0x6fd   :  { %v856_v54 = vpack.c.bf16 %v2735_v22, %v2733_v21 }
 0x6ff   :  { %884 = vrot.lane.b32.xlu1 %v856_v54, %s2437_s2 }
 0x771   :  { %v885_v34 = vpop.permute.xlu1 %884 }
 0x772   :  { %2076 = vmatmul.mubr.msk.bf16.vlgmr.msra.gmra.mxu0 %vm420_vm1, %v885_v34 }
 0x773   :  { %1130 = vmatpush1.bf16.msra.mxu0 %v2508_v5  ;;  %1153 = vmatprep.mubr.bf16.mxu0 %v2436_v1 }
 0x774   :  { %1131 = vmatprep.subr.bf16.mxu0 %v2517_v7 }
 0x777   :  { %1132 = vmatpush1.bf16.msra.mxu0 %v2526_v8 }
 0x778   :  { %1133 = vmatprep.subr.bf16.mxu0 %v2533_v9 }
 0x77b   :  { %1134 = vmatpush1.bf16.msra.mxu0 %v2542_v11 }
 0x77c   :  { %1135 = vmatprep.subr.bf16.mxu0 %v2548_v12 }
 0x77f   :  { %1136 = vmatpush1.bf16.msra.mxu0 %v2556_v13 }
 0x832   :  { %v923_v27 = vpop.f32.mrf.mxu0 }
 0x833   :  { %v932_v31 = vadd.f32 %v923_v27, %v880_v49 }
 0x834   :  { %v925_v56 = vpop.f32.mrf.mxu0 }
 0x835   :  { %v936_v57 = vmul.f32 0.5, %v932_v31  ;;  %v933_v59 = vadd.f32 %v925_v56, %v881_v55 }
 0x836   :  { %v927_v60 = vpop.f32.mrf.mxu0 }
 0x837   :  { %2372 = vtanh.f32 %v936_v57  ;;  %v934_v61 = vadd.f32 %v927_v60, %v882_v58  ;;  %v946_v25 = vmul.f32 0.5, %v933_v59  ;;  %v235_v57 = vadd.f32 %v2755_v39, %v2583_v19 }
 0x838   :  { %v929_v36 = vpop.f32.mrf.mxu0  ;;  %2374 = vtanh.f32 %v933_v59 }
 0x839   :  { %v937_v0 = vmul.f32 0.5, %v934_v61  ;;  %v935_v6 = vadd.f32 %v929_v36, %v883_v2 }
 0x83b   :  { %2376 = vtanh.f32 %v937_v0  ;;  %v947_v26 = vmul.f32 0.5, %v935_v6 }
 0x83c   :  { %2378 = vtanh.f32 %v935_v6 }
 0x83d   :  { %2380 = vtanh.f32 %v946_v25 }
 0x83e   :  { %2382 = vtanh.f32 %v947_v26 }
 0x844   :  { %v2373_v10 = vpop.eup %2372 }
 0x845   :  { %v940_v14 = vmul.f32 0.5, %v2373_v10  ;;  %v2375_v15 = vpop.eup %2374 }
 0x847   :  { %v942_v16 = vadd.f32 0.5, %v940_v14 }
 0x848   :  { %v2377_v17 = vpop.eup %2376 }
 0x849   :  { %v941_v18 = vmul.f32 0.5, %v2377_v17  ;;  %v956_v50 = vmul.f32 %v2375_v15, %v942_v16  ;;  %v2379_v23 = vpop.eup %2378  ;;  %v954_v4 = vmul.f32 %v942_v16, %v2726_v40 }
 0x84a   :  { %v2381_v38 = vpop.eup %2380 }
 0x84b   :  { %v943_v54 = vadd.f32 0.5, %v941_v18  ;;  %960 = vrot.lane.b32.xlu0 %v956_v50, %s2437_s2  ;;  %v2383_v43 = vpop.eup %2382  ;;  %v950_v44 = vmul.f32 0.5, %v2381_v38 }
 0x84c   :  { %v951_v46 = vmul.f32 0.5, %v2383_v43 }
 0x84d   :  { %v957_v24 = vmul.f32 %v2379_v23, %v943_v54  ;;  %v955_v32 = vmul.f32 %v943_v54, %v2730_v3  ;;  %v952_v49 = vadd.f32 0.5, %v950_v44 }
 0x84e   :  { %v953_v27 = vadd.f32 0.5, %v951_v46 }
 0x84f   :  { %962 = vrot.lane.b32.xlu1 %v957_v24, %s2437_s2 }
 0x8bd   :  { %v961_v28 = vpop.permute.xlu0 %960 }
 0x8be   :  { %v2764_v30 = vadd.f32 %v961_v28, %v954_v4 }
 0x8c0   :  { %2384 = vtanh.f32 %v2764_v30 }
 0x8c1   :  { %v963_v34 = vpop.permute.xlu1 %962 }
 0x8c2   :  { %v2768_v35 = vadd.f32 %v963_v34, %v955_v32 }
 0x8c4   :  { %2386 = vtanh.f32 %v2768_v35 }
 0x8cd   :  { %v2385_v48 = vpop.eup %2384 }
 0x8ce   :  { %v2771_v31 = vmul.f32 %v2385_v48, %v952_v49 }
 0x8d1   :  { %v2387_v40 = vpop.eup %2386 }
 0x8d2   :  { %v2773_v55 = vmul.f32 %v2387_v40, %v953_v27  ;;  %v1112_v40 = vunpack.c.l.bf16 %v2589_v29 }
 0x8d4   :  { %v972_v3 = vpack.c.bf16 %v2773_v55, %v2771_v31 }
 0x8d6   :  { %1000 = vrot.lane.b32.xlu0 %v972_v3, %s2437_s2 }
 0x948   :  { %v1001_v56 = vpop.permute.xlu0 %1000 }
 0x949   :  { %2079 = vmatmul.mubr.msk.bf16.vlgmr.msra.gmra.mxu1 %vm420_vm1, %v1001_v56 }
 0x94a   :  { %1246 = vmatpush1.bf16.msra.mxu1 %v2508_v5  ;;  %1269 = vmatprep.mubr.bf16.mxu1 %v2436_v1  ;;  %v237_v5 = vadd.f32 %v2759_v47, %v2585_v20  ;;  %v996_v1 = vunpack.c.l.bf16 %v2742_v33 }
 0x94b   :  { %1247 = vmatprep.subr.bf16.mxu1 %v2517_v7 }
 0x94c   :  { %v2147_v58 = vpack.c.bf16 %v237_v5, %v235_v57  ;;  %v1113_v57 = vunpack.c.h.bf16 %v2589_v29 }
 0x94e   :  { %1248 = vmatpush1.bf16.msra.mxu1 %v2526_v8  ;;  %v997_v8 = vunpack.c.h.bf16 %v2742_v33  ;;  %v999_v19 = vunpack.c.h.bf16 %v2147_v58 }
 0x94f   :  { %1249 = vmatprep.subr.bf16.mxu1 %v2533_v9 }
 0x952   :  { %1250 = vmatpush1.bf16.msra.mxu1 %v2542_v11  ;;  %v998_v11 = vunpack.c.l.bf16 %v2147_v58 }
 0x953   :  { %1251 = vmatprep.subr.bf16.mxu1 %v2548_v12 }
 0x956   :  { %1252 = vmatpush1.bf16.msra.mxu1 %v2556_v13 }
 0xa09   :  { %v1039_v7 = vpop.f32.mrf.mxu1 }
 0xa0a   :  { %v1048_v59 = vadd.f32 %v1039_v7, %v996_v1  ;;  %v1114_v1 = vunpack.c.l.bf16 %v2595_v37 }
 0xa0b   :  { %v1041_v9 = vpop.f32.mrf.mxu1 }
 0xa0c   :  { %v1052_v60 = vmul.f32 0.5, %v1048_v59  ;;  %v1049_v61 = vadd.f32 %v1041_v9, %v997_v8 }
 0xa0d   :  { %v1043_v12 = vpop.f32.mrf.mxu1 }
 0xa0e   :  { %2388 = vtanh.f32 %v1052_v60  ;;  %v1050_v13 = vadd.f32 %v1043_v12, %v998_v11  ;;  %v1062_v18 = vmul.f32 0.5, %v1049_v61  ;;  %v1115_v11 = vunpack.c.h.bf16 %v2595_v37 }
 0xa0f   :  { %v1045_v36 = vpop.f32.mrf.mxu1  ;;  %2390 = vtanh.f32 %v1049_v61 }
 0xa10   :  { %v1053_v0 = vmul.f32 0.5, %v1050_v13  ;;  %v1051_v20 = vadd.f32 %v1045_v36, %v999_v19 }
 0xa12   :  { %2392 = vtanh.f32 %v1053_v0  ;;  %v1063_v50 = vmul.f32 0.5, %v1051_v20 }
 0xa13   :  { %2394 = vtanh.f32 %v1051_v20 }
 0xa14   :  { %2396 = vtanh.f32 %v1062_v18 }
 0xa15   :  { %2398 = vtanh.f32 %v1063_v50 }
 0xa1b   :  { %v2389_v39 = vpop.eup %2388 }
 0xa1c   :  { %v1056_v47 = vmul.f32 0.5, %v2389_v39  ;;  %v2391_v2 = vpop.eup %2390 }
 0xa1e   :  { %v1058_v6 = vadd.f32 0.5, %v1056_v47 }
 0xa1f   :  { %v2393_v10 = vpop.eup %2392 }
 0xa20   :  { %v1057_v33 = vmul.f32 0.5, %v2393_v10  ;;  %v1072_v14 = vmul.f32 %v2391_v2, %v1058_v6  ;;  %v2395_v16 = vpop.eup %2394  ;;  %v1070_v54 = vmul.f32 %v1058_v6, %v2764_v30 }
 0xa21   :  { %v2397_v28 = vpop.eup %2396 }
 0xa22   :  { %v1059_v15 = vadd.f32 0.5, %v1057_v33  ;;  %1076 = vrot.lane.b32.xlu1 %v1072_v14, %s2437_s2  ;;  %v2399_v32 = vpop.eup %2398  ;;  %v1066_v34 = vmul.f32 0.5, %v2397_v28 }
 0xa23   :  { %v1067_v38 = vmul.f32 0.5, %v2399_v32 }
 0xa24   :  { %v1073_v17 = vmul.f32 %v2395_v16, %v1059_v15  ;;  %v1071_v25 = vmul.f32 %v1059_v15, %v2768_v35  ;;  %v1068_v44 = vadd.f32 0.5, %v1066_v34 }
 0xa25   :  { %v1069_v46 = vadd.f32 0.5, %v1067_v38 }
 0xa26   :  { %1078 = vrot.lane.b32.xlu0 %v1073_v17, %s2437_s2 }
 0xa94   :  { %v1077_v23 = vpop.permute.xlu1 %1076 }
 0xa95   :  { %v1082_v24 = vadd.f32 %v1077_v23, %v1070_v54 }
 0xa97   :  { %2400 = vtanh.f32 %v1082_v24 }
 0xa98   :  { %v1079_v26 = vpop.permute.xlu0 %1078 }
 0xa99   :  { %v1083_v4 = vadd.f32 %v1079_v26, %v1071_v25 }
 0xa9b   :  { %2402 = vtanh.f32 %v1083_v4 }
 0xaa4   :  { %v2401_v43 = vpop.eup %2400 }
 0xaa5   :  { %v2797_v49 = vmul.f32 %v2401_v43, %v1068_v44  ;;  %v1228_v43 = vunpack.c.l.bf16 %v2601_v45 }
 0xaa8   :  { %v2403_v48 = vpop.eup %2402 }
 0xaa9   :  { %v2799_v27 = vmul.f32 %v2403_v48, %v1069_v46  ;;  %v1229_v48 = vunpack.c.h.bf16 %v2601_v45  ;;  %v2286_v45 = vld [vmem:[%s3089_s4 + $0x18] sm:$0xff]  }
 0xaaa   :  { %2198 = vmatprep.subr.bf16.mxu0 %v2286_v45 }
 0xaab   :  { %v1088_v30 = vpack.c.bf16 %v2799_v27, %v2797_v49 }
 0xaad   :  { %1116 = vrot.lane.b32.xlu1 %v1088_v30, %s2437_s2 }
 0xb1f   :  { %v1117_v35 = vpop.permute.xlu1 %1116 }
 0xb20   :  { %2082 = vmatmul.mubr.msk.bf16.vlgmr.msra.gmra.mxu0 %vm420_vm1, %v1117_v35 }
 0xb21   :  { %2199 = vmatpush3.bf16.msra.mxu0 %v2286_v45 }
 0xbe0   :  { %v1155_v3 = vpop.f32.mrf.mxu0 }
 0xbe1   :  { %v1164_v56 = vadd.f32 %v1155_v3, %v1112_v40  ;;  %v1230_v40 = vunpack.c.l.bf16 %v2605_v52 }
 0xbe2   :  { %v1157_v5 = vpop.f32.mrf.mxu0 }
 0xbe3   :  { %v1168_v58 = vmul.f32 0.5, %v1164_v56  ;;  %v1165_v7 = vadd.f32 %v1157_v5, %v1113_v57 }
 0xbe4   :  { %v1159_v59 = vpop.f32.mrf.mxu0 }
 0xbe5   :  { %2404 = vtanh.f32 %v1168_v58  ;;  %v1166_v8 = vadd.f32 %v1159_v59, %v1114_v1  ;;  %v1178_v6 = vmul.f32 0.5, %v1165_v7  ;;  %v1231_v1 = vunpack.c.h.bf16 %v2605_v52 }
 0xbe6   :  { %v1161_v9 = vpop.f32.mrf.mxu0  ;;  %2406 = vtanh.f32 %v1165_v7 }
 0xbe7   :  { %v1169_v60 = vmul.f32 0.5, %v1166_v8  ;;  %v1167_v61 = vadd.f32 %v1161_v9, %v1115_v11  ;;  %v2287_v9 = vld [vmem:[%s3089_s4 + $0x10] sm:$0xff]  }
 0xbe8   :  { %2200 = vmatprep.subr.bf16.mxu0 %v2287_v9 }
 0xbe9   :  { %2408 = vtanh.f32 %v1169_v60  ;;  %v1179_v37 = vmul.f32 0.5, %v1167_v61  ;;  %2201 = vmatpush3.bf16.msra.mxu0 %v2287_v9 }
 0xbea   :  { %2410 = vtanh.f32 %v1167_v61 }
 0xbeb   :  { %2412 = vtanh.f32 %v1178_v6 }
 0xbec   :  { %2414 = vtanh.f32 %v1179_v37 }
 0xbf2   :  { %v2405_v12 = vpop.eup %2404 }
 0xbf3   :  { %v1172_v13 = vmul.f32 0.5, %v2405_v12  ;;  %v2407_v36 = vpop.eup %2406 }
 0xbf5   :  { %v1174_v29 = vadd.f32 0.5, %v1172_v13  ;;  %v2288_v13 = vld [vmem:[%s3089_s4 + $0x8] sm:$0xff]  }
 0xbf6   :  { %v2409_v0 = vpop.eup %2408  ;;  %2202 = vmatprep.subr.bf16.mxu0 %v2288_v13 }
 0xbf7   :  { %v1173_v19 = vmul.f32 0.5, %v2409_v0  ;;  %v1188_v20 = vmul.f32 %v2407_v36, %v1174_v29  ;;  %v2411_v47 = vpop.eup %2410  ;;  %v1186_v10 = vmul.f32 %v1174_v29, %v1082_v24  ;;  %v2152_v0 = vpack.c.bf16 %v2620_v41, %v2620_v41  ;;  %2203 = vmatpush3.bf16.msra.mxu0 %v2288_v13 }
 0xbf8   :  { %v2413_v18 = vpop.eup %2412  ;;  %v2156_v41 = vpack.c.bf16 %v2692_v62, %v2692_v62  ;;  %v2160_v62 = vpack.c.bf16 %v2771_v31, %v2771_v31 }
 0xbf9   :  { %v1175_v39 = vadd.f32 0.5, %v1173_v19  ;;  %1192 = vrot.lane.b32.xlu0 %v1188_v20, %s2437_s2  ;;  %v2415_v50 = vpop.eup %2414  ;;  %v1182_v54 = vmul.f32 0.5, %v2413_v18  ;;  %v2289_v20 = vld [vmem:[%s3089_s4] sm:$0xff]  }
 0xbfa   :  { %v1183_v23 = vmul.f32 0.5, %v2415_v50  ;;  %2204 = vmatprep.subr.bf16.mxu0 %v2289_v20 }
 0xbfb   :  { %v1189_v2 = vmul.f32 %v2411_v47, %v1175_v39  ;;  %v1187_v15 = vmul.f32 %v1175_v39, %v1083_v4  ;;  %v1184_v26 = vadd.f32 0.5, %v1182_v54  ;;  %v2154_v39 = vpack.c.bf16 %v2656_v51, %v2656_v51  ;;  %2205 = vmatpush3.bf16.msra.mxu0 %v2289_v20 }
 0xbfc   :  { %v1185_v28 = vadd.f32 0.5, %v1183_v23  ;;  %v2153_v47 = vpack.c.bf16 %v2622_v42, %v2622_v42  ;;  %v2158_v51 = vpack.c.bf16 %v2733_v21, %v2733_v21  ;;  %v2157_v42 = vpack.c.bf16 %v2694_v63, %v2694_v63 }
 0xbfd   :  { %1194 = vrot.lane.b32.xlu1 %v1189_v2, %s2437_s2  ;;  %v2155_v2 = vpack.c.bf16 %v2658_v53, %v2658_v53  ;;  %v2159_v53 = vpack.c.bf16 %v2735_v22, %v2735_v22  ;;  %v2162_v21 = vpack.c.bf16 %v2797_v49, %v2797_v49  ;;  %v2161_v63 = vpack.c.bf16 %v2773_v55, %v2773_v55 }
 0xbfe   :  { %v2163_v22 = vpack.c.bf16 %v2799_v27, %v2799_v27 }
 0xc6b   :  { %v1193_v33 = vpop.permute.xlu0 %1192 }
 0xc6c   :  { %v2811_v14 = vadd.f32 %v1193_v33, %v1186_v10 }
 0xc6e   :  { %2416 = vtanh.f32 %v2811_v14 }
 0xc6f   :  { %v1195_v16 = vpop.permute.xlu1 %1194 }
 0xc70   :  { %v2814_v17 = vadd.f32 %v1195_v16, %v1187_v15 }
 0xc72   :  { %2418 = vtanh.f32 %v2814_v17 }
 0xc7b   :  { %v2417_v25 = vpop.eup %2416 }
 0xc7c   :  { %v2817_v24 = vmul.f32 %v2417_v25, %v1184_v26 }
 0xc7e   :  { %v2164_v31 = vpack.c.bf16 %v2817_v24, %v2817_v24 }
 0xc7f   :  { %v2419_v32 = vpop.eup %2418 }
 0xc80   :  { %v2819_v34 = vmul.f32 %v2419_v32, %v1185_v28 }
 0xc82   :  { %v1204_v4 = vpack.c.bf16 %v2819_v34, %v2817_v24  ;;  %v2165_v49 = vpack.c.bf16 %v2819_v34, %v2819_v34 }
 0xc84   :  { %1232 = vrot.lane.b32.xlu0 %v1204_v4, %s2437_s2 }
 0xcf6   :  { %v1233_v38 = vpop.permute.xlu0 %1232 }
 0xcf7   :  { %2085 = vmatmul.mubr.msk.bf16.vlgmr.msra.gmra.mxu1 %vm420_vm1, %v1233_v38 }
 0xdb7   :  { %v1271_v44 = vpop.f32.mrf.mxu1 }
 0xdb8   :  { %v1280_v46 = vadd.f32 %v1271_v44, %v1228_v43 }
 0xdb9   :  { %v1273_v30 = vpop.f32.mrf.mxu1 }
 0xdba   :  { %v1284_v35 = vmul.f32 0.5, %v1280_v46  ;;  %v2828_v3 = vadd.f32 %v1273_v30, %v1229_v48 }
 0xdbb   :  { %v1275_v56 = vpop.f32.mrf.mxu1 }
 0xdbc   :  { %2420 = vtanh.f32 %v1284_v35  ;;  %v1282_v57 = vadd.f32 %v1275_v56, %v1230_v40  ;;  %v1294_v55 = vmul.f32 0.5, %v2828_v3 }
 0xdbd   :  { %v1277_v5 = vpop.f32.mrf.mxu1  ;;  %2422 = vtanh.f32 %v2828_v3 }
 0xdbe   :  { %v1285_v58 = vmul.f32 0.5, %v1282_v57  ;;  %v1283_v7 = vadd.f32 %v1277_v5, %v1231_v1 }
 0xdc0   :  { %2424 = vtanh.f32 %v1285_v58  ;;  %v1295_v6 = vmul.f32 0.5, %v1283_v7 }
 0xdc1   :  { %2426 = vtanh.f32 %v1283_v7 }
 0xdc2   :  { %2428 = vtanh.f32 %v1294_v55 }
 0xdc3   :  { %2430 = vtanh.f32 %v1295_v6 }
 0xdc9   :  { %v2421_v59 = vpop.eup %2420 }
 0xdca   :  { %v1288_v8 = vmul.f32 0.5, %v2421_v59  ;;  %v2423_v60 = vpop.eup %2422 }
 0xdcc   :  { %v1290_v11 = vadd.f32 0.5, %v1288_v8 }
 0xdcd   :  { %v2425_v52 = vpop.eup %2424 }
 0xdce   :  { %v1289_v61 = vmul.f32 0.5, %v2425_v52  ;;  %v1304_v12 = vmul.f32 %v2423_v60, %v1290_v11  ;;  %v2427_v29 = vpop.eup %2426  ;;  %v1302_v37 = vmul.f32 %v1290_v11, %v2811_v14 }
 0xdcf   :  { %v2429_v50 = vpop.eup %2428 }
 0xdd0   :  { %v1291_v36 = vadd.f32 0.5, %v1289_v61  ;;  %1308 = vrot.lane.b32.xlu1 %v1304_v12, %s2437_s2  ;;  %v1298_v14 = vmul.f32 0.5, %v2429_v50  ;;  %v2431_v25 = vpop.eup %2430  ;;  %v2298_v12 = vld [vmem:[%s3090_s7] sm:$0xff]  }
 0xdd1   :  { %2222 = vmatprep.subr.bf16.mxu1 %v2298_v12 }
 0xdd2   :  { %v1305_v19 = vmul.f32 %v2427_v29, %v1291_v36  ;;  %v1303_v27 = vmul.f32 %v1291_v36, %v2814_v17  ;;  %v1299_v17 = vmul.f32 0.5, %v2431_v25  ;;  %v1300_v32 = vadd.f32 0.5, %v1298_v14  ;;  %v2299_v36 = vld [vmem:[%s3091_s6] sm:$0xff]   ;;  %2223 = vmatpush3.bf16.msra.mxu1 %v2298_v12  ;;  %s2438_s6 = smov 112  }
 0xdd3   :  { %v2926_v29 = vld [vmem:[%s3092_s5] ss:$0 sm:$0xff]  ;;  %2240 = vmatprep.subr.bf16.mxu0 %v2299_v36 }
 0xdd4   :  { %514 = vrot.lane.b32.xlu1 %v2152_v0, %s2437_s2  ;;  %1310 = vrot.lane.b32.xlu0 %v1305_v19, %s2437_s2  ;;  %v1301_v46 = vadd.f32 0.5, %v1299_v17  ;;  %v2300_v19 = vld [vmem:[%s3086_s0] sm:$0xff]   ;;  %v2306_v17 = vld [vmem:[%s3086_s0 + $0x30] sm:$0xff]  }
 0xdd5   :  { %2224 = vmatprep.mubr.msk.bf16.mxu1 %vm121_vm0, %v2300_v19 }
 0xdd8   :  { %631 = vrot.lane.b32.xlu1 %v2154_v39, %s2437_s2  ;;  %516 = vrot.lane.b32.xlu0 %v2153_v47, %s2437_s2  ;;  %v2301_v39 = vld [vmem:[%s3086_s0 + $0x8] sm:$0xff]  }
 0xdd9   :  { %2225 = vmatmul.mubr.msk.bf16.vlgmr.msra.gmra.mxu1 %vm121_vm0, %v2301_v39 }
 0xddc   :  { %747 = vrot.lane.b32.xlu1 %v2156_v41, %s2437_s2  ;;  %633 = vrot.lane.b32.xlu0 %v2155_v2, %s2437_s2 }
 0xde0   :  { %863 = vrot.lane.b32.xlu1 %v2158_v51, %s2437_s2  ;;  %749 = vrot.lane.b32.xlu0 %v2157_v42, %s2437_s2 }
 0xde4   :  { %979 = vrot.lane.b32.xlu1 %v2160_v62, %s2437_s2  ;;  %865 = vrot.lane.b32.xlu0 %v2159_v53, %s2437_s2  ;;  %v2302_v53 = vld [vmem:[%s3086_s0 + $0x10] sm:$0xff]  }
 0xde5   :  { %2228 = vmatprep.mubr.msk.bf16.mxu1 %vm121_vm0, %v2302_v53 }
 0xde8   :  { %1095 = vrot.lane.b32.xlu1 %v2162_v21, %s2437_s2  ;;  %981 = vrot.lane.b32.xlu0 %v2161_v63, %s2437_s2 }
 0xdec   :  { %1211 = vrot.lane.b32.xlu1 %v2164_v31, %s2437_s2  ;;  %1097 = vrot.lane.b32.xlu0 %v2163_v22, %s2437_s2  ;;  %v2303_v31 = vld [vmem:[%s3086_s0 + $0x18] sm:$0xff]  }
 0xded   :  { %2229 = vmatmul.mubr.msk.bf16.gmra.mxu1 %vm121_vm0, %v2303_v31 }
 0xdf0   :  { %1213 = vrot.lane.b32.xlu0 %v2165_v49, %s2437_s2 }
 0xe42   :  { %v1309_v10 = vpop.permute.xlu1 %1308 }
 0xe43   :  { %v1314_v33 = vadd.f32 %v1309_v10, %v1302_v37 }
 0xe45   :  { %2432 = vtanh.f32 %v1314_v33  ;;  %v2304_v33 = vld [vmem:[%s3086_s0 + $0x20] sm:$0xff]  }
 0xe46   :  { %v515_v15 = vpop.permute.xlu1 %514  ;;  %v1311_v16 = vpop.permute.xlu0 %1310  ;;  %2232 = vmatprep.mubr.msk.bf16.mxu1 %vm121_vm0, %v2304_v33 }
 0xe47   :  { %525 = vst.msk [vmem:[#allocation3] sm:$0xf] %vm524_vm2, %v515_v15  ;;  %v1315_v18 = vadd.f32 %v1311_v16, %v1303_v27  ;;  %v2305_v16 = vld [vmem:[%s3086_s0 + $0x28] sm:$0xff]  }
 0xe48   :  { %2233 = vmatmul.mubr.msk.bf16.gmra.mxu1 %vm121_vm0, %v2305_v16 }
 0xe49   :  { %2434 = vtanh.f32 %v1315_v18  ;;  %2236 = vmatprep.mubr.msk.bf16.mxu1 %vm121_vm0, %v2306_v17 }
 0xe4a   :  { %v632_v54 = vpop.permute.xlu1 %631  ;;  %v517_v23 = vpop.permute.xlu0 %516 }
 0xe4b   :  { %641 = vst.msk [vmem:[#allocation3 + $0x8] sm:$0xf] %vm524_vm2, %v632_v54  ;;  %526 = vst.msk [vmem:[#allocation3 + $0x4] sm:$0xf] %vm524_vm2, %v517_v23 }
 0xe4e   :  { %v748_v26 = vpop.permute.xlu1 %747  ;;  %v634_v28 = vpop.permute.xlu0 %633 }
 0xe4f   :  { %757 = vst.msk [vmem:[#allocation3 + $0x10] sm:$0xf] %vm524_vm2, %v748_v26  ;;  %642 = vst.msk [vmem:[#allocation3 + $0xc] sm:$0xf] %vm524_vm2, %v634_v28 }
 0xe52   :  { %v2433_v24 = vpop.eup %2432  ;;  %v864_v34 = vpop.permute.xlu1 %863  ;;  %v2290_v38 = vld [vmem:[#allocation3] sm:$0xff]  }
 0xe53   :  { %v750_v4 = vpop.permute.xlu0 %749  ;;  %873 = vst.msk [vmem:[#allocation3 + $0x18] sm:$0xf] %vm524_vm2, %v864_v34  ;;  %v1318_v43 = vmul.f32 %v2433_v24, %v1300_v32  ;;  %2206 = vmatprep.mubr.msk.bf16.mxu0 %vm420_vm1, %v2290_v38  ;;  %v2307_v34 = vld [vmem:[%s3086_s0 + $0x38] sm:$0xff]  }
 0xe54   :  { %758 = vst.msk [vmem:[#allocation3 + $0x14] sm:$0xf] %vm524_vm2, %v750_v4  ;;  %2237 = vmatmul.mubr.msk.bf16.gmra.mxu1 %vm121_vm0, %v2307_v34 }
 0xe55   :  { %v2166_v44 = vpack.c.bf16 %v1318_v43, %v1318_v43 }
 0xe56   :  { %v2435_v48 = vpop.eup %2434  ;;  %v980_v30 = vpop.permute.xlu1 %979  ;;  %v2291_v40 = vld [vmem:[#allocation3 + $0x8] sm:$0xff]  }
 0xe57   :  { %v866_v35 = vpop.permute.xlu0 %865  ;;  %989 = vst.msk [vmem:[#allocation3 + $0x20] sm:$0xf] %vm524_vm2, %v980_v30  ;;  %1327 = vrot.lane.b32.xlu1 %v2166_v44, %s2437_s2  ;;  %v1319_v3 = vmul.f32 %v2435_v48, %v1301_v46  ;;  %2207 = vmatmul.mubr.msk.bf16.vlgmr.msra.gmra.mxu0 %vm420_vm1, %v2291_v40 }
 0xe58   :  { %874 = vst.msk [vmem:[#allocation3 + $0x1c] sm:$0xf] %vm524_vm2, %v866_v35  ;;  %2241 = vmatpush3.bf16.msra.mxu0 %v2299_v36 }
 0xe59   :  { %v2167_v56 = vpack.c.bf16 %v1319_v3, %v1319_v3 }
 0xe5a   :  { %v1096_v57 = vpop.permute.xlu1 %1095 }
 0xe5b   :  { %v982_v5 = vpop.permute.xlu0 %981  ;;  %v2292_v58 = vld [vmem:[#allocation3 + $0x10] sm:$0xff]   ;;  %1105 = vst.msk [vmem:[#allocation3 + $0x28] sm:$0xf] %vm524_vm2, %v1096_v57  ;;  %1329 = vrot.lane.b32.xlu0 %v2167_v56, %s2437_s2 }
 0xe5c   :  { %990 = vst.msk [vmem:[#allocation3 + $0x24] sm:$0xf] %vm524_vm2, %v982_v5  ;;  %2210 = vmatprep.mubr.msk.bf16.mxu0 %vm420_vm1, %v2292_v58 }
 0xe5e   :  { %v1212_v1 = vpop.permute.xlu1 %1211 }
 0xe5f   :  { %v1098_v7 = vpop.permute.xlu0 %1097  ;;  %v2293_v45 = vld [vmem:[#allocation3 + $0x18] sm:$0xff]   ;;  %1221 = vst.msk [vmem:[#allocation3 + $0x30] sm:$0xf] %vm524_vm2, %v1212_v1 }
 0xe60   :  { %1106 = vst.msk [vmem:[#allocation3 + $0x2c] sm:$0xf] %vm524_vm2, %v1098_v7  ;;  %2211 = vmatmul.mubr.msk.bf16.gmra.mxu0 %vm420_vm1, %v2293_v45 }
 0xe63   :  { %v1214_v59 = vpop.permute.xlu0 %1213  ;;  %v2294_v8 = vld [vmem:[#allocation3 + $0x20] sm:$0xff]  }
 0xe64   :  { %1222 = vst.msk [vmem:[#allocation3 + $0x34] sm:$0xf] %vm524_vm2, %v1214_v59  ;;  %2214 = vmatprep.mubr.msk.bf16.mxu0 %vm420_vm1, %v2294_v8 }
 0xe67   :  { %v2295_v9 = vld [vmem:[#allocation3 + $0x28] sm:$0xff]  }
 0xe68   :  { %2215 = vmatmul.mubr.msk.bf16.gmra.mxu0 %vm420_vm1, %v2295_v9 }
 0xe6b   :  { %v2296_v60 = vld [vmem:[#allocation3 + $0x30] sm:$0xff]  }
 0xe6c   :  { %2218 = vmatprep.mubr.msk.bf16.mxu0 %vm420_vm1, %v2296_v60 }
 0xec9   :  { %v1328_v11 = vpop.permute.xlu1 %1327 }
 0xeca   :  { %1337 = vst.msk [vmem:[#allocation3 + $0x38] sm:$0xf] %vm524_vm2, %v1328_v11 }
 0xecd   :  { %v1330_v52 = vpop.permute.xlu0 %1329 }
 0xece   :  { %1338 = vst.msk [vmem:[#allocation3 + $0x3c] sm:$0xf] %vm524_vm2, %v1330_v52 }
 0xed5   :  { %v2297_v61 = vld [vmem:[#allocation3 + $0x38] sm:$0xff]  }
 0xed6   :  { %2219 = vmatmul.mubr.msk.bf16.gmra.mxu0 %vm420_vm1, %v2297_v61 }
 0xf17   :  { %v2208_v13 = vpop.f32.mrf.mxu0 }
 0xf18   :  { %v1501_v2 = vadd.f32 %v2208_v13, %v2926_v29 }
 0xf19   :  { %v1492_v0 = vpop.f32.mrf.mxu0 }
 0xf1a   :  { %v1493_v20 = vadd.f32 %v2926_v29, %v1492_v0 }
 0xf1b   :  { %v2209_v47 = vpop.f32.mrf.mxu0 }
 0xf1c   :  { %1571 = vrot.lane.b32.xlu1 %v1493_v20, %s2438_s6  ;;  %v1504_v21 = vadd.f32 %v2209_v47, %v2926_v29 }
 0xf1d   :  { %v1495_v41 = vpop.f32.mrf.mxu0 }
 0xf1e   :  { %v1496_v51 = vadd.f32 %v2926_v29, %v1495_v41 }
 0xf20   :  { %v2212_v42 = vpop.f32.mrf.mxu0  ;;  %1573 = vrot.lane.b32.xlu0 %v1496_v51, %s2438_s6  ;;  %1575 = vrot.lane.b32.xlu1 %v1501_v2, %s2438_s6 }
 0xf21   :  { %v1517_v55 = vadd.f32 %v2212_v42, %v2926_v29 }
 0xf22   :  { %v1508_v62 = vpop.f32.mrf.mxu0 }
 0xf23   :  { %v1509_v63 = vadd.f32 %v2926_v29, %v1508_v62 }
 0xf24   :  { %v2213_v22 = vpop.f32.mrf.mxu0  ;;  %1577 = vrot.lane.b32.xlu0 %v1504_v21, %s2438_s6 }
 0xf25   :  { %1579 = vrot.lane.b32.xlu1 %v1509_v63, %s2438_s6  ;;  %v1520_v27 = vadd.f32 %v2213_v22, %v2926_v29 }
 0xf26   :  { %v1511_v49 = vpop.f32.mrf.mxu0 }
 0xf27   :  { %v1512_v6 = vadd.f32 %v2926_v29, %v1511_v49  ;;  %v2226_v49 = vpop.f32.mrf.mxu1 }
 0xf28   :  { %v2216_v37 = vpop.f32.mrf.mxu0 }
 0xf29   :  { %1581 = vrot.lane.b32.xlu0 %v1512_v6, %s2438_s6  ;;  %1583 = vrot.lane.b32.xlu1 %v1517_v55, %s2438_s6  ;;  %v1533_v54 = vadd.f32 %v2216_v37, %v2926_v29 }
 0xf2a   :  { %v1524_v10 = vpop.f32.mrf.mxu0 }
 0xf2b   :  { %v1525_v15 = vadd.f32 %v2926_v29, %v1524_v10 }
 0xf2c   :  { %v2217_v18 = vpop.f32.mrf.mxu0 }
 0xf2d   :  { %1585 = vrot.lane.b32.xlu0 %v1520_v27, %s2438_s6  ;;  %1587 = vrot.lane.b32.xlu1 %v1525_v15, %s2438_s6  ;;  %v1536_v14 = vadd.f32 %v2217_v18, %v2926_v29 }
 0xf2e   :  { %v1527_v50 = vpop.f32.mrf.mxu0 }
 0xf2f   :  { %v1528_v23 = vadd.f32 %v2926_v29, %v1527_v50 }
 0xf31   :  { %1589 = vrot.lane.b32.xlu0 %v1528_v23, %s2438_s6  ;;  %1591 = vrot.lane.b32.xlu1 %v1533_v54, %s2438_s6 }
 0xf35   :  { %1593 = vrot.lane.b32.xlu0 %v1536_v14, %s2438_s6 }
 0xf8e   :  { %v1572_v25 = vpop.permute.xlu1 %1571 }
 0xf8f   :  { %v1619_v32 = vmul.f32 %v1572_v25, %v1493_v20 }
 0xf92   :  { %v1576_v26 = vpop.permute.xlu1 %1575  ;;  %v1574_v28 = vpop.permute.xlu0 %1573 }
 0xf93   :  { %v1620_v24 = vmul.f32 %v1574_v28, %v1496_v51  ;;  %v1621_v46 = vmul.f32 %v1576_v26, %v1501_v2 }
 0xf95   :  { %v1635_v4 = vpack.c.bf16 %v1620_v24, %v1619_v32 }
 0xf96   :  { %v2220_v43 = vpop.f32.mrf.mxu0  ;;  %v1578_v44 = vpop.permute.xlu0 %1577 }
 0xf97   :  { %v1580_v38 = vpop.permute.xlu1 %1579  ;;  %2242 = vmatprep.mubr.msk.bf16.mxu0 %vm121_vm0, %v1635_v4  ;;  %v1622_v48 = vmul.f32 %v1578_v44, %v1504_v21  ;;  %v1549_v7 = vadd.f32 %v2220_v43, %v2926_v29 }
 0xf98   :  { %v1540_v30 = vpop.f32.mrf.mxu0  ;;  %v1623_v5 = vmul.f32 %v1580_v38, %v1509_v63 }
 0xf99   :  { %v1541_v35 = vadd.f32 %v2926_v29, %v1540_v30  ;;  %v1636_v40 = vpack.c.bf16 %v1622_v48, %v1621_v46 }
 0xf9a   :  { %v2221_v56 = vpop.f32.mrf.mxu0 }
 0xf9b   :  { %v1584_v3 = vpop.permute.xlu1 %1583  ;;  %v1582_v57 = vpop.permute.xlu0 %1581  ;;  %1595 = vrot.lane.b32.xlu1 %v1541_v35, %s2438_s6  ;;  %2243 = vmatmul.mubr.msk.bf16.vlgmr.msra.gmra.mxu0 %vm121_vm0, %v1636_v40  ;;  %v1552_v52 = vadd.f32 %v2221_v56, %v2926_v29 }
 0xf9c   :  { %v1624_v58 = vmul.f32 %v1582_v57, %v1512_v6  ;;  %v1543_v1 = vpop.f32.mrf.mxu0  ;;  %v1625_v60 = vmul.f32 %v1584_v3, %v1517_v55  ;;  %v1767_v55 = vpop.f32.mrf.mxu1 }
 0xf9d   :  { %v1544_v45 = vadd.f32 %v2926_v29, %v1543_v1 }
 0xf9e   :  { %v1637_v59 = vpack.c.bf16 %v1624_v58, %v1623_v5  ;;  %v2227_v6 = vpop.f32.mrf.mxu1 }
 0xf9f   :  { %v1588_v8 = vpop.permute.xlu1 %1587  ;;  %v1586_v9 = vpop.permute.xlu0 %1585  ;;  %1597 = vrot.lane.b32.xlu0 %v1544_v45, %s2438_s6  ;;  %1599 = vrot.lane.b32.xlu1 %v1549_v7, %s2438_s6 }
 0xfa0   :  { %v1626_v11 = vmul.f32 %v1586_v9, %v1520_v27  ;;  %2246 = vmatprep.mubr.msk.bf16.mxu0 %vm121_vm0, %v1637_v59  ;;  %v1627_v13 = vmul.f32 %v1588_v8, %v1525_v15  ;;  %v1770_v37 = vpop.f32.mrf.mxu1  ;;  %v3003_v15 = vld [vmem:[%s3093_s8] ss:$0 sm:$0xff] }
 0xfa2   :  { %v1638_v61 = vpack.c.bf16 %v1626_v11, %v1625_v60  ;;  %v2230_v10 = vpop.f32.mrf.mxu1 }
 0xfa3   :  { %v1590_v12 = vpop.permute.xlu0 %1589  ;;  %1601 = vrot.lane.b32.xlu0 %v1552_v52, %s2438_s6  ;;  %v1592_v0 = vpop.permute.xlu1 %1591 }
 0xfa4   :  { %v1628_v36 = vmul.f32 %v1590_v12, %v1528_v23  ;;  %2247 = vmatmul.mubr.msk.bf16.gmra.mxu0 %vm121_vm0, %v1638_v61  ;;  %v1629_v39 = vmul.f32 %v1592_v0, %v1533_v54  ;;  %v1783_v33 = vpop.f32.mrf.mxu1 }
 0xfa6   :  { %v1639_v19 = vpack.c.bf16 %v1628_v36, %v1627_v13  ;;  %v2231_v16 = vpop.f32.mrf.mxu1 }
 0xfa7   :  { %v1594_v20 = vpop.permute.xlu0 %1593 }
 0xfa8   :  { %v1630_v47 = vmul.f32 %v1594_v20, %v1536_v14  ;;  %2250 = vmatprep.mubr.msk.bf16.mxu0 %vm121_vm0, %v1639_v19  ;;  %v1786_v25 = vpop.f32.mrf.mxu1 }
 0xfaa   :  { %v1640_v41 = vpack.c.bf16 %v1630_v47, %v1629_v39  ;;  %v2234_v4 = vpop.f32.mrf.mxu1 }
 0xfac   :  { %2251 = vmatmul.mubr.msk.bf16.gmra.mxu0 %vm121_vm0, %v1640_v41 }
0x100d   :  { %v1596_v2 = vpop.permute.xlu1 %1595 }
0x100e   :  { %v1631_v51 = vmul.f32 %v1596_v2, %v1541_v35  ;;  %v1799_v35 = vpop.f32.mrf.mxu1 }
0x1010   :  { %v2235_v1 = vpop.f32.mrf.mxu1 }
0x1011   :  { %v1598_v29 = vpop.permute.xlu0 %1597  ;;  %v1600_v62 = vpop.permute.xlu1 %1599 }
0x1012   :  { %v1632_v42 = vmul.f32 %v1598_v29, %v1544_v45  ;;  %v1633_v63 = vmul.f32 %v1600_v62, %v1549_v7  ;;  %v1802_v11 = vpop.f32.mrf.mxu1 }
0x1014   :  { %v1641_v53 = vpack.c.bf16 %v1632_v42, %v1631_v51  ;;  %v2238_v19 = vpop.f32.mrf.mxu1 }
0x1015   :  { %v1602_v21 = vpop.permute.xlu0 %1601 }
0x1016   :  { %v1634_v31 = vmul.f32 %v1602_v21, %v1552_v52  ;;  %2254 = vmatprep.mubr.msk.bf16.mxu0 %vm121_vm0, %v1641_v53  ;;  %v1815_v20 = vpop.f32.mrf.mxu1 }
0x1018   :  { %v1642_v22 = vpack.c.bf16 %v1634_v31, %v1633_v63  ;;  %v2239_v41 = vpop.f32.mrf.mxu1 }
0x101a   :  { %2255 = vmatmul.mubr.msk.bf16.gmra.mxu0 %vm121_vm0, %v1642_v22  ;;  %v1818_v21 = vpop.f32.mrf.mxu1 }
0x105b   :  { %v2244_v27 = vpop.f32.mrf.mxu0 }
0x105c   :  { %v1903_v18 = vadd.f32 %v2244_v27, %v2226_v49 }
0x105d   :  { %v1894_v50 = vpop.f32.mrf.mxu0 }
0x105e   :  { %v1966_v54 = vadd.f32 %v3003_v15, %v1903_v18  ;;  %v1895_v23 = vadd.f32 %v1894_v50, %v1767_v55 }
0x105f   :  { %v2245_v14 = vpop.f32.mrf.mxu0 }
0x1060   :  { %1982 = vst.msk [vmem:[%s3094_s9 + $0x10] sm:$0xff] %vm121_vm0, %v1966_v54  ;;  %v1964_v26 = vadd.f32 %v3003_v15, %v1895_v23  ;;  %v1906_v28 = vadd.f32 %v2245_v14, %v2227_v6 }
0x1061   :  { %v1897_v17 = vpop.f32.mrf.mxu0 }
0x1062   :  { %1980 = vst.msk [vmem:[%s3094_s9] sm:$0xff] %vm121_vm0, %v1964_v26  ;;  %v1967_v32 = vadd.f32 %v3003_v15, %v1906_v28  ;;  %v1898_v24 = vadd.f32 %v1897_v17, %v1770_v37 }
0x1064   :  { %v2248_v34 = vpop.f32.mrf.mxu0  ;;  %1983 = vst.msk [vmem:[%s3094_s9 + $0x18] sm:$0xff] %vm121_vm0, %v1967_v32  ;;  %v1965_v38 = vadd.f32 %v3003_v15, %v1898_v24 }
0x1065   :  { %v1919_v43 = vadd.f32 %v2248_v34, %v2230_v10 }
0x1066   :  { %v1910_v44 = vpop.f32.mrf.mxu0  ;;  %1981 = vst.msk [vmem:[%s3094_s9 + $0x8] sm:$0xff] %vm121_vm0, %v1965_v38 }
0x1067   :  { %v1970_v46 = vadd.f32 %v3003_v15, %v1919_v43  ;;  %v1911_v48 = vadd.f32 %v1910_v44, %v1783_v33 }
0x1068   :  { %v2249_v30 = vpop.f32.mrf.mxu0 }
0x1069   :  { %1986 = vst.msk [vmem:[%s3094_s9 + $0x30] sm:$0xff] %vm121_vm0, %v1970_v46  ;;  %v1968_v40 = vadd.f32 %v3003_v15, %v1911_v48  ;;  %v1922_v3 = vadd.f32 %v2249_v30, %v2231_v16 }
0x106a   :  { %v1913_v56 = vpop.f32.mrf.mxu0 }
0x106b   :  { %1984 = vst.msk [vmem:[%s3094_s9 + $0x20] sm:$0xff] %vm121_vm0, %v1968_v40  ;;  %v1971_v57 = vadd.f32 %v3003_v15, %v1922_v3  ;;  %v1914_v5 = vadd.f32 %v1913_v56, %v1786_v25 }
0x106c   :  { %v2252_v58 = vpop.f32.mrf.mxu0 }
0x106d   :  { %1987 = vst.msk [vmem:[%s3094_s9 + $0x38] sm:$0xff] %vm121_vm0, %v1971_v57  ;;  %v1969_v7 = vadd.f32 %v3003_v15, %v1914_v5  ;;  %v1935_v45 = vadd.f32 %v2252_v58, %v2234_v4 }
0x106e   :  { %v1926_v59 = vpop.f32.mrf.mxu0 }
0x106f   :  { %1985 = vst.msk [vmem:[%s3094_s9 + $0x28] sm:$0xff] %vm121_vm0, %v1969_v7  ;;  %v1974_v8 = vadd.f32 %v3003_v15, %v1935_v45  ;;  %v1927_v9 = vadd.f32 %v1926_v59, %v1799_v35 }
0x1070   :  { %v2253_v60 = vpop.f32.mrf.mxu0 }
0x1071   :  { %1990 = vst.msk [vmem:[%s3094_s9 + $0x50] sm:$0xff] %vm121_vm0, %v1974_v8  ;;  %v1972_v52 = vadd.f32 %v3003_v15, %v1927_v9  ;;  %v1938_v61 = vadd.f32 %v2253_v60, %v2235_v1 }
0x1072   :  { %v1929_v12 = vpop.f32.mrf.mxu0 }
0x1073   :  { %1988 = vst.msk [vmem:[%s3094_s9 + $0x40] sm:$0xff] %vm121_vm0, %v1972_v52  ;;  %v1975_v13 = vadd.f32 %v3003_v15, %v1938_v61  ;;  %v1930_v36 = vadd.f32 %v1929_v12, %v1802_v11 }
0x1075   :  { %1991 = vst.msk [vmem:[%s3094_s9 + $0x58] sm:$0xff] %vm121_vm0, %v1975_v13  ;;  %v1973_v0 = vadd.f32 %v3003_v15, %v1930_v36 }
0x1077   :  { %1989 = vst.msk [vmem:[%s3094_s9 + $0x48] sm:$0xff] %vm121_vm0, %v1973_v0 }
0x10da   :  { %v2256_v39 = vpop.f32.mrf.mxu0 }
0x10db   :  { %v1951_v47 = vadd.f32 %v2256_v39, %v2238_v19 }
0x10dc   :  { %v1942_v2 = vpop.f32.mrf.mxu0 }
0x10dd   :  { %v1978_v29 = vadd.f32 %v3003_v15, %v1951_v47  ;;  %v1943_v51 = vadd.f32 %v1942_v2, %v1815_v20 }
0x10de   :  { %v2257_v42 = vpop.f32.mrf.mxu0 }
0x10df   :  { %1994 = vst.msk [vmem:[%s3094_s9 + $0x70] sm:$0xff] %vm121_vm0, %v1978_v29  ;;  %v1976_v62 = vadd.f32 %v3003_v15, %v1943_v51  ;;  %v1954_v53 = vadd.f32 %v2257_v42, %v2239_v41 }
0x10e0   :  { %v1945_v63 = vpop.f32.mrf.mxu0 }
0x10e1   :  { %1992 = vst.msk [vmem:[%s3094_s9 + $0x60] sm:$0xff] %vm121_vm0, %v1976_v62  ;;  %v1979_v31 = vadd.f32 %v3003_v15, %v1954_v53  ;;  %v1946_v22 = vadd.f32 %v1945_v63, %v1818_v21 }
0x10e3   :  { %1995 = vst.msk [vmem:[%s3094_s9 + $0x78] sm:$0xff] %vm121_vm0, %v1979_v31  ;;  %v1977_v49 = vadd.f32 %v3003_v15, %v1946_v22 }
0x10e5   :  { %1993 = vst.msk [vmem:[%s3094_s9 + $0x68] sm:$0xff] %vm121_vm0, %v1977_v49 }

</bundles_post_ra>
